<compile_context>
chip_gen: v7x
topology: tpu7x:2x2x1
jax: 0.10.0
libtpu: 0.0.40
codegen_flags: <defaults>
</compile_context>

<pallas_src>
import functools

import jax
import jax.numpy as jnp
from jax import lax
from jax.experimental import pallas as pl
from jax.experimental.pallas import tpu as pltpu

LANE = 128      # one vreg lane block: packed [fwd | bwd] hidden width
SUBLANE = 8


def _round_up(x, m):
    return ((x + m - 1) // m) * m


# -----------------------------------------------------------------------------
# Pallas kernel
# -----------------------------------------------------------------------------
def _encoder_kernel(
    x_ref,      # (T*Bp, 128) bf16: row-block t = [x_t | x_{T-1-t} | 0-pad] in lanes
    wi_ref,     # (128, 384)  bf16: input weights, gate cols [r | z | n], each
                #             128 wide with [fwd 0:H | bwd H:2H] inside
    bi_ref,     # (1, 384)    f32 : b_ih (all gates) + b_hh (r,z gates) combined
    wh_ref,     # (128, 384)  bf16: hidden weights, same layout, per-direction
                #             block-diagonal inside every gate block
    bh_ref,     # (1, 128)    f32 : n-gate hidden bias only (stays inside r*(.))
    wp_ref,     # (128, 128)  bf16: output projection W.T, zero padded
    bp_ref,     # (1, 128)    f32 : projection bias
    out_ref,    # (T, Bp, 128) f32: row t = [h_fwd(t) | h_bwd(T-1-t) | pad]
    hid_ref,    # (Bp, 128)   f32 : tanh(Linear(mean_over_time(output)))
    xi_ref,     # scratch (T*Bp, 384) f32: precomputed input-gate preactivations
):
    T, Bp, G = out_ref.shape                    # G == 128 == one gate block

    # (1) Hoisted input projection: one MXU matmul covering every timestep and
    #     both directions (off the serial per-step dependence chain).
    xi_ref[...] = (
        jnp.dot(x_ref[...], wi_ref[...], preferred_element_type=jnp.float32)
        + bi_ref[...]
    )

    wh = wh_ref[...]                            # (G, 3G) bf16, hoisted
    bh_n = bh_ref[...]                          # (1, G)  f32, n-gate only

    # (2) Fused bidirectional recurrence: h is (Bp, 128) with fwd in lanes
    #     [0:H] and bwd in lanes [H:2H]; one K=128 gate-stacked dot per step
    #     serves both directions and all three gates.  Padded / cross-direction
    #     lanes stay exactly zero (block-diagonal weights, zero biases).
    def step(t, carry):
        h, hsum = carry                                        # (Bp, G) f32
        row = pl.multiple_of(t * Bp, Bp)
        xi = xi_ref[pl.ds(row, Bp), :]                         # (Bp, 3G) f32
        hh = jnp.dot(h.astype(jnp.bfloat16), wh,
                     preferred_element_type=jnp.float32)       # (Bp, 3G) f32
        r = jax.nn.sigmoid(xi[:, :G] + hh[:, :G])
        z = jax.nn.sigmoid(xi[:, G:2 * G] + hh[:, G:2 * G])
        n = jnp.tanh(xi[:, 2 * G:] + r * (hh[:, 2 * G:] + bh_n))
        h = (1.0 - z) * n + z * h
        out_ref[t] = h                                         # ONE (8,128) store
        return h, hsum + h

    h0 = jnp.zeros((Bp, G), jnp.float32)
    _, hsum = lax.fori_loop(0, T, step, (h0, h0), unroll=min(T, 8))

    # (3) mean over time + fused Linear(2H -> H) + tanh: the [fwd | bwd] lane
    #     layout of hsum already IS the concatenated mean -> one (Bp,128)x(128,128) dot.
    mean = hsum * (1.0 / T)
    hid_ref[...] = jnp.tanh(
        jnp.dot(mean.astype(jnp.bfloat16), wp_ref[...],
                preferred_element_type=jnp.float32)
        + bp_ref[...]
    )


# -----------------------------------------------------------------------------
# Wrapper
# -----------------------------------------------------------------------------
@functools.partial(jax.jit, static_argnames=("hidden_size",))
def encoder_rnn_forward(tokens, kparams, *, hidden_size):
    """tokens: (B, T) int32.  Returns (output (B,T,2H), hidden (1,B,H))."""
    B, T = tokens.shape
    H = hidden_size
    assert 2 * H <= LANE, "packed-direction kernel requires 2*hidden_size <= 128"
    Bp = _round_up(max(B, 1), SUBLANE)

    # Embedding lookup (+ dropout == identity in eval mode) -- glue in XLA.
    emb = kparams["embedding"]                              # (V, H) f32, unpadded
    xs = jnp.transpose(jnp.take(emb, tokens, axis=0), (1, 0, 2))   # (T, B, H)
    # Pack fwd/bwd inputs into ONE 128-lane block: lanes [0:H]=x_t, [H:2H]=x_{T-1-t}.
    xp = jnp.concatenate([xs, xs[::-1]], axis=-1)                  # (T, B, 2H)
    xp = jnp.pad(xp, ((0, 0), (0, Bp - B), (0, LANE - 2 * H)))     # (T, Bp, 128)
    x_flat = xp.reshape(T * Bp, LANE).astype(jnp.bfloat16)

    # Explicit VMEM budget (buffers + headroom), per perf review.
    nbytes = (
        x_flat.size * 2
        + (kparams["wi"].size + kparams["wh"].size + kparams["wp"].size) * 2
        + (kparams["bi"].size + kparams["bh"].size + kparams["bp"].size) * 4
        + T * Bp * LANE * 4 + Bp * LANE * 4        # outputs (f32)
        + T * Bp * 3 * LANE * 4                    # xi scratch (f32)
    )
    vmem_limit = min(int(nbytes) * 2 + (4 << 20), 128 << 20)

    vmem = pl.BlockSpec(memory_space=pltpu.MemorySpace.VMEM)
    out, hid = pl.pallas_call(
        _encoder_kernel,
        out_shape=(
            jax.ShapeDtypeStruct((T, Bp, LANE), jnp.float32),
            jax.ShapeDtypeStruct((Bp, LANE), jnp.float32),
        ),
        in_specs=[vmem] * 7,
        out_specs=(vmem, vmem),
        scratch_shapes=[pltpu.VMEM((T * Bp, 3 * LANE), jnp.float32)],
        compiler_params=pltpu.CompilerParams(vmem_limit_bytes=vmem_limit),
    )(
        x_flat,
        kparams["wi"], kparams["bi"],
        kparams["wh"], kparams["bh"],
        kparams["wp"], kparams["bp"],
    )

    # Unpack: fwd half already in time order; bwd half stored at reversed rows.
    fwd = out[:, :B, :H]                                     # (T, B, H)
    bwd = out[::-1, :B, H:2 * H]                             # (T, B, H)
    output = jnp.transpose(jnp.concatenate([fwd, bwd], axis=-1), (1, 0, 2))
    hidden = hid[:B, :H][None]                               # (1, B, H)
    return output, hidden


# -----------------------------------------------------------------------------
# Parameter packing: PyTorch-layout params -> packed 128-lane kernel layout
# -----------------------------------------------------------------------------
def pack_params(params):
    H = params["w_proj"].shape[0]
    assert 2 * H <= LANE
    G = LANE
    f32 = jnp.float32

    def gate_t(w, g):               # (3H, H) PyTorch layout -> gate g, transposed (H, H)
        return w[g * H:(g + 1) * H].T

    def pack_w(wf, wb):             # -> (128, 384) bf16, gate cols [r|z|n], [fwd|bwd] inside
        W = jnp.zeros((G, 3 * G), f32)
        for g in range(3):
            W = W.at[:H, g * G:g * G + H].set(gate_t(wf, g))
            W = W.at[H:2 * H, g * G + H:g * G + 2 * H].set(gate_t(wb, g))
        return W.astype(jnp.bfloat16)

    # Combined input bias: b_ih for all gates + b_hh for r/z (they commute with
    # the sum); the n-gate hidden bias must stay inside r*(.) per PyTorch GRU.
    bi = jnp.zeros((1, 3 * G), f32)
    for g in range(3):
        bf = params["b_ih_f"][g * H:(g + 1) * H]
        bb = params["b_ih_b"][g * H:(g + 1) * H]
        if g < 2:
            bf = bf + params["b_hh_f"][g * H:(g + 1) * H]
            bb = bb + params["b_hh_b"][g * H:(g + 1) * H]
        bi = bi.at[0, g * G:g * G + H].set(bf)
        bi = bi.at[0, g * G + H:g * G + 2 * H].set(bb)
    bh = jnp.zeros((1, G), f32)
    bh = bh.at[0, :H].set(params["b_hh_f"][2 * H:])
    bh = bh.at[0, H:2 * H].set(params["b_hh_b"][2 * H:])

    wpt = params["w_proj"].T                                  # (2H, H)
    wp = jnp.zeros((G, G), f32)
    wp = wp.at[:H, :H].set(wpt[:H]).at[H:2 * H, :H].set(wpt[H:])
    bp = jnp.zeros((1, G), f32).at[0, :H].set(params["b_proj"])

    return {
        "embedding": params["embedding"].astype(f32),
        "wi": pack_w(params["w_ih_f"], params["w_ih_b"]), "bi": bi,
        "wh": pack_w(params["w_hh_f"], params["w_hh_b"]), "bh": bh,
        "wp": wp.astype(jnp.bfloat16), "bp": bp,
    }


# -----------------------------------------------------------------------------
# Pure-JAX reference (PyTorch GRU semantics, PyTorch-layout parameters)
# -----------------------------------------------------------------------------
def encoder_rnn_reference(tokens, params):
    emb = params["embedding"]
    H = emb.shape[1]
    B, T = tokens.shape
    hi = jax.lax.Precision.HIGHEST

    xs = jnp.transpose(jnp.take(emb, tokens, axis=0), (1, 0, 2))   # (T, B, H)

    def run(xseq, w_ih, w_hh, b_ih, b_hh):
        def cell(h, x_t):
            gi = jnp.dot(x_t, w_ih.T, precision=hi) + b_ih
            gh = jnp.dot(h, w_hh.T, precision=hi) + b_hh
            r = jax.nn.sigmoid(gi[:, :H] + gh[:, :H])
            z = jax.nn.sigmoid(gi[:, H:2 * H] + gh[:, H:2 * H])
            n = jnp.tanh(gi[:, 2 * H:] + r * gh[:, 2 * H:])
            h = (1.0 - z) * n + z * h
            return h, h
        _, hs = lax.scan(cell, jnp.zeros((B, H), jnp.float32), xseq)
        return hs                                                  # (T, B, H)

    hs_f = run(xs, params["w_ih_f"], params["w_hh_f"], params["b_ih_f"], params["b_hh_f"])
    hs_b = run(xs[::-1], params["w_ih_b"], params["w_hh_b"], params["b_ih_b"], params["b_hh_b"])[::-1]
    output = jnp.transpose(jnp.concatenate([hs_f, hs_b], axis=-1), (1, 0, 2))  # (B, T, 2H)
    mean_h = output.mean(axis=1)
    hid = jnp.tanh(jnp.dot(mean_h, params["w_proj"].T, precision=hi) + params["b_proj"])
    return output, hid[None]


# -----------------------------------------------------------------------------
# Deterministic parameter init (shapes/dists from EncoderRNN.__init__)
# -----------------------------------------------------------------------------
def init_params(key, input_size, hidden_size):
    H = hidden_size
    ks = jax.random.split(key, 11)
    kg = 1.0 / jnp.sqrt(H)
    kl = 1.0 / jnp.sqrt(2.0 * H)

    def u(k, shape, bound):
        return jax.random.uniform(k, shape, jnp.float32, -bound, bound)

    return {
        "embedding": jax.random.normal(ks[0], (input_size, H), jnp.float32),
        # GRU, PyTorch layout: weight_* (3H, H) gate-stacked (r, z, n), bias_* (3H,)
        "w_ih_f": u(ks[1], (3 * H, H), kg), "w_hh_f": u(ks[2], (3 * H, H), kg),
        "b_ih_f": u(ks[3], (3 * H,), kg),   "b_hh_f": u(ks[4], (3 * H,), kg),
        "w_ih_b": u(ks[5], (3 * H, H), kg), "w_hh_b": u(ks[6], (3 * H, H), kg),
        "b_ih_b": u(ks[7], (3 * H,), kg),   "b_hh_b": u(ks[8], (3 * H,), kg),
        # Linear(2H, H), PyTorch layout: weight (H, 2H), bias (H,)
        "w_proj": u(ks[9], (H, 2 * H), kl), "b_proj": u(ks[10], (H,), kl),
    }


if __name__ == "__main__":
    INPUT_SIZE = 16   # vocab
    HIDDEN = 32
    B, T = 2, 8

    key = jax.random.PRNGKey(0)
    k_par, k_tok = jax.random.split(key)
    params = init_params(k_par, INPUT_SIZE, HIDDEN)
    kparams = pack_params(params)                       # packed once, reused per call
    tokens = jax.random.randint(k_tok, (B, T), 0, INPUT_SIZE, dtype=jnp.int32)

    out, hid = encoder_rnn_forward(tokens, kparams, hidden_size=HIDDEN)
    out = jax.block_until_ready(out)
    hid = jax.block_until_ready(hid)

    ref_out, ref_hid = encoder_rnn_reference(tokens, params)
    assert out.shape == (B, T, 2 * HIDDEN), out.shape
    assert hid.shape == (1, B, HIDDEN), hid.shape
    # Tolerance loosened deliberately: the kernel feeds bf16 operands to the MXU
    # (per perf review) while the reference uses f32 HIGHEST precision.  Real
    # layout / gate-semantics bugs produce O(0.1-1) errors and are still caught.
    TOL = 5e-2
    assert jnp.allclose(out, ref_out, atol=TOL, rtol=TOL), \
        float(jnp.max(jnp.abs(out - ref_out)))
    assert jnp.allclose(hid, ref_hid, atol=TOL, rtol=TOL), \
        float(jnp.max(jnp.abs(hid - ref_hid)))

    print("KERNEL_OK")
</pallas_src>

<mosaic_0001>
module attributes {stable_mosaic.version = 11 : i64} {
  func.func @_encoder_kernel(%arg0: memref<64x128xbf16, #tpu.memory_space<vmem>>, %arg1: memref<128x384xbf16, #tpu.memory_space<vmem>>, %arg2: memref<1x384xf32, #tpu.memory_space<vmem>>, %arg3: memref<128x384xbf16, #tpu.memory_space<vmem>>, %arg4: memref<1x128xf32, #tpu.memory_space<vmem>>, %arg5: memref<128x128xbf16, #tpu.memory_space<vmem>>, %arg6: memref<1x128xf32, #tpu.memory_space<vmem>>, %arg7: memref<8x8x128xf32, #tpu.memory_space<vmem>>, %arg8: memref<8x128xf32, #tpu.memory_space<vmem>>, %arg9: memref<64x384xf32, #tpu.memory_space<vmem>>) attributes {dimension_semantics = [], scalar_prefetch = 0 : i64, scratch_operands = 1 : i64, tpu.core_type = #tpu.core_type<tc>} {
    %c0 = arith.constant 0 : index
    %c0_0 = arith.constant 0 : index
    %0 = vector.load %arg0[%c0, %c0_0] : memref<64x128xbf16, #tpu.memory_space<vmem>>, vector<64x128xbf16>
    %c0_1 = arith.constant 0 : index
    %c0_2 = arith.constant 0 : index
    %1 = vector.load %arg1[%c0_1, %c0_2] : memref<128x384xbf16, #tpu.memory_space<vmem>>, vector<128x384xbf16>
    %cst = arith.constant dense<0.000000e+00> : vector<64x384xf32>
    %2 = tpu.matmul %0, %1, %cst {dimension_numbers = #tpu.dot_dimension_numbers<[1], [0], [0], [1], [0, 0, 1, 1], [], []>} : vector<64x128xbf16>, vector<128x384xbf16>, vector<64x384xf32> -> vector<64x384xf32>
    %c0_3 = arith.constant 0 : index
    %c0_4 = arith.constant 0 : index
    %3 = vector.load %arg2[%c0_3, %c0_4] : memref<1x384xf32, #tpu.memory_space<vmem>>, vector<1x384xf32>
    %4 = vector.broadcast %3 : vector<1x384xf32> to vector<64x384xf32>
    %5 = arith.addf %2, %4 : vector<64x384xf32>
    %c0_5 = arith.constant 0 : index
    %c0_6 = arith.constant 0 : index
    %6 = vector.load %arg9[%c0_5, %c0_6] : memref<64x384xf32, #tpu.memory_space<vmem>>, vector<64x384xf32>
    tpu.vector_store %arg9[%c0_5, %c0_6], %5 {strides = array<i32>} : memref<64x384xf32, #tpu.memory_space<vmem>>, vector<64x384xf32>,
    %c0_7 = arith.constant 0 : index
    %c0_8 = arith.constant 0 : index
    %7 = vector.load %arg3[%c0_7, %c0_8] : memref<128x384xbf16, #tpu.memory_space<vmem>>, vector<128x384xbf16>
    %c0_9 = arith.constant 0 : index
    %c0_10 = arith.constant 0 : index
    %8 = vector.load %arg4[%c0_9, %c0_10] : memref<1x128xf32, #tpu.memory_space<vmem>>, vector<1x128xf32>
    %cst_11 = arith.constant 0.000000e+00 : f32
    %9 = vector.broadcast %cst_11 : f32 to vector<8x128xf32>
    %c0_i32 = arith.constant 0 : i32
    %c8_i32 = arith.constant 8 : i32
    %10 = arith.muli %c0_i32, %c8_i32 : i32
    %11 = tpu.assume_multiple %10, 8 : i32
    %12 = arith.index_cast %11 : i32 to index
    %c0_12 = arith.constant 0 : index
    %13 = vector.load %arg9[%12, %c0_12] : memref<64x384xf32, #tpu.memory_space<vmem>>, vector<8x384xf32>
    %14 = arith.truncf %9 : vector<8x128xf32> to vector<8x128xbf16>
    %cst_13 = arith.constant dense<0.000000e+00> : vector<8x384xf32>
    %15 = tpu.matmul %14, %7, %cst_13 {dimension_numbers = #tpu.dot_dimension_numbers<[1], [0], [0], [1], [0, 0, 1, 1], [], []>} : vector<8x128xbf16>, vector<128x384xbf16>, vector<8x384xf32> -> vector<8x384xf32>
    %16 = vector.extract_strided_slice %13 {offsets = [0, 0], sizes = [8, 128], strides = [1, 1]} : vector<8x384xf32> to vector<8x128xf32>
    %17 = vector.extract_strided_slice %15 {offsets = [0, 0], sizes = [8, 128], strides = [1, 1]} : vector<8x384xf32> to vector<8x128xf32>
    %18 = arith.addf %16, %17 : vector<8x128xf32>
    %19 = arith.negf %18 : vector<8x128xf32>
    %20 = math.exp %19 : vector<8x128xf32>
    %cst_14 = arith.constant 1.000000e+00 : f32
    %21 = vector.broadcast %cst_14 : f32 to vector<8x128xf32>
    %22 = arith.addf %21, %20 : vector<8x128xf32>
    %23 = arith.divf %21, %22 : vector<8x128xf32>
    %24 = vector.extract_strided_slice %13 {offsets = [0, 128], sizes = [8, 128], strides = [1, 1]} : vector<8x384xf32> to vector<8x128xf32>
    %25 = vector.extract_strided_slice %15 {offsets = [0, 128], sizes = [8, 128], strides = [1, 1]} : vector<8x384xf32> to vector<8x128xf32>
    %26 = arith.addf %24, %25 : vector<8x128xf32>
    %27 = arith.negf %26 : vector<8x128xf32>
    %28 = math.exp %27 : vector<8x128xf32>
    %cst_15 = arith.constant 1.000000e+00 : f32
    %29 = vector.broadcast %cst_15 : f32 to vector<8x128xf32>
    %30 = arith.addf %29, %28 : vector<8x128xf32>
    %31 = arith.divf %29, %30 : vector<8x128xf32>
    %32 = vector.extract_strided_slice %13 {offsets = [0, 256], sizes = [8, 128], strides = [1, 1]} : vector<8x384xf32> to vector<8x128xf32>
    %33 = vector.extract_strided_slice %15 {offsets = [0, 256], sizes = [8, 128], strides = [1, 1]} : vector<8x384xf32> to vector<8x128xf32>
    %34 = vector.broadcast %8 : vector<1x128xf32> to vector<8x128xf32>
    %35 = arith.addf %33, %34 : vector<8x128xf32>
    %36 = arith.mulf %23, %35 : vector<8x128xf32>
    %37 = arith.addf %32, %36 : vector<8x128xf32>
    %38 = math.tanh %37 : vector<8x128xf32>
    %cst_16 = arith.constant 1.000000e+00 : f32
    %39 = vector.broadcast %cst_16 : f32 to vector<8x128xf32>
    %40 = arith.subf %39, %31 : vector<8x128xf32>
    %41 = arith.mulf %40, %38 : vector<8x128xf32>
    %42 = arith.mulf %31, %9 : vector<8x128xf32>
    %43 = arith.addf %41, %42 : vector<8x128xf32>
    %44 = arith.index_cast %c0_i32 : i32 to index
    %c0_17 = arith.constant 0 : index
    %c0_18 = arith.constant 0 : index
    %45 = vector.load %arg7[%44, %c0_17, %c0_18] : memref<8x8x128xf32, #tpu.memory_space<vmem>>, vector<1x8x128xf32>
    %46 = vector.shape_cast %45 : vector<1x8x128xf32> to vector<8x128xf32>
    %47 = vector.shape_cast %43 : vector<8x128xf32> to vector<1x8x128xf32>
    tpu.vector_store %arg7[%44, %c0_17, %c0_18], %47 {strides = array<i32>} : memref<8x8x128xf32, #tpu.memory_space<vmem>>, vector<1x8x128xf32>,
    %48 = arith.addf %9, %43 : vector<8x128xf32>
    %c1_i32 = arith.constant 1 : i32
    %c8_i32_19 = arith.constant 8 : i32
    %49 = arith.muli %c1_i32, %c8_i32_19 : i32
    %50 = tpu.assume_multiple %49, 8 : i32
    %51 = arith.index_cast %50 : i32 to index
    %c0_20 = arith.constant 0 : index
    %52 = vector.load %arg9[%51, %c0_20] : memref<64x384xf32, #tpu.memory_space<vmem>>, vector<8x384xf32>
    %53 = arith.truncf %43 : vector<8x128xf32> to vector<8x128xbf16>
    %cst_21 = arith.constant dense<0.000000e+00> : vector<8x384xf32>
    %54 = tpu.matmul %53, %7, %cst_21 {dimension_numbers = #tpu.dot_dimension_numbers<[1], [0], [0], [1], [0, 0, 1, 1], [], []>} : vector<8x128xbf16>, vector<128x384xbf16>, vector<8x384xf32> -> vector<8x384xf32>
    %55 = vector.extract_strided_slice %52 {offsets = [0, 0], sizes = [8, 128], strides = [1, 1]} : vector<8x384xf32> to vector<8x128xf32>
    %56 = vector.extract_strided_slice %54 {offsets = [0, 0], sizes = [8, 128], strides = [1, 1]} : vector<8x384xf32> to vector<8x128xf32>
    %57 = arith.addf %55, %56 : vector<8x128xf32>
    %58 = arith.negf %57 : vector<8x128xf32>
    %59 = math.exp %58 : vector<8x128xf32>
    %cst_22 = arith.constant 1.000000e+00 : f32
    %60 = vector.broadcast %cst_22 : f32 to vector<8x128xf32>
    %61 = arith.addf %60, %59 : vector<8x128xf32>
    %62 = arith.divf %60, %61 : vector<8x128xf32>
    %63 = vector.extract_strided_slice %52 {offsets = [0, 128], sizes = [8, 128], strides = [1, 1]} : vector<8x384xf32> to vector<8x128xf32>
    %64 = vector.extract_strided_slice %54 {offsets = [0, 128], sizes = [8, 128], strides = [1, 1]} : vector<8x384xf32> to vector<8x128xf32>
    %65 = arith.addf %63, %64 : vector<8x128xf32>
    %66 = arith.negf %65 : vector<8x128xf32>
    %67 = math.exp %66 : vector<8x128xf32>
    %cst_23 = arith.constant 1.000000e+00 : f32
    %68 = vector.broadcast %cst_23 : f32 to vector<8x128xf32>
    %69 = arith.addf %68, %67 : vector<8x128xf32>
    %70 = arith.divf %68, %69 : vector<8x128xf32>
    %71 = vector.extract_strided_slice %52 {offsets = [0, 256], sizes = [8, 128], strides = [1, 1]} : vector<8x384xf32> to vector<8x128xf32>
    %72 = vector.extract_strided_slice %54 {offsets = [0, 256], sizes = [8, 128], strides = [1, 1]} : vector<8x384xf32> to vector<8x128xf32>
    %73 = vector.broadcast %8 : vector<1x128xf32> to vector<8x128xf32>
    %74 = arith.addf %72, %73 : vector<8x128xf32>
    %75 = arith.mulf %62, %74 : vector<8x128xf32>
    %76 = arith.addf %71, %75 : vector<8x128xf32>
    %77 = math.tanh %76 : vector<8x128xf32>
    %cst_24 = arith.constant 1.000000e+00 : f32
    %78 = vector.broadcast %cst_24 : f32 to vector<8x128xf32>
    %79 = arith.subf %78, %70 : vector<8x128xf32>
    %80 = arith.mulf %79, %77 : vector<8x128xf32>
    %81 = arith.mulf %70, %43 : vector<8x128xf32>
    %82 = arith.addf %80, %81 : vector<8x128xf32>
    %83 = arith.index_cast %c1_i32 : i32 to index
    %c0_25 = arith.constant 0 : index
    %c0_26 = arith.constant 0 : index
    %84 = vector.load %arg7[%83, %c0_25, %c0_26] : memref<8x8x128xf32, #tpu.memory_space<vmem>>, vector<1x8x128xf32>
    %85 = vector.shape_cast %84 : vector<1x8x128xf32> to vector<8x128xf32>
    %86 = vector.shape_cast %82 : vector<8x128xf32> to vector<1x8x128xf32>
    tpu.vector_store %arg7[%83, %c0_25, %c0_26], %86 {strides = array<i32>} : memref<8x8x128xf32, #tpu.memory_space<vmem>>, vector<1x8x128xf32>,
    %87 = arith.addf %48, %82 : vector<8x128xf32>
    %c2_i32 = arith.constant 2 : i32
    %c8_i32_27 = arith.constant 8 : i32
    %88 = arith.muli %c2_i32, %c8_i32_27 : i32
    %89 = tpu.assume_multiple %88, 8 : i32
    %90 = arith.index_cast %89 : i32 to index
    %c0_28 = arith.constant 0 : index
    %91 = vector.load %arg9[%90, %c0_28] : memref<64x384xf32, #tpu.memory_space<vmem>>, vector<8x384xf32>
    %92 = arith.truncf %82 : vector<8x128xf32> to vector<8x128xbf16>
    %cst_29 = arith.constant dense<0.000000e+00> : vector<8x384xf32>
    %93 = tpu.matmul %92, %7, %cst_29 {dimension_numbers = #tpu.dot_dimension_numbers<[1], [0], [0], [1], [0, 0, 1, 1], [], []>} : vector<8x128xbf16>, vector<128x384xbf16>, vector<8x384xf32> -> vector<8x384xf32>
    %94 = vector.extract_strided_slice %91 {offsets = [0, 0], sizes = [8, 128], strides = [1, 1]} : vector<8x384xf32> to vector<8x128xf32>
    %95 = vector.extract_strided_slice %93 {offsets = [0, 0], sizes = [8, 128], strides = [1, 1]} : vector<8x384xf32> to vector<8x128xf32>
    %96 = arith.addf %94, %95 : vector<8x128xf32>
    %97 = arith.negf %96 : vector<8x128xf32>
    %98 = math.exp %97 : vector<8x128xf32>
    %cst_30 = arith.constant 1.000000e+00 : f32
    %99 = vector.broadcast %cst_30 : f32 to vector<8x128xf32>
    %100 = arith.addf %99, %98 : vector<8x128xf32>
    %101 = arith.divf %99, %100 : vector<8x128xf32>
    %102 = vector.extract_strided_slice %91 {offsets = [0, 128], sizes = [8, 128], strides = [1, 1]} : vector<8x384xf32> to vector<8x128xf32>
    %103 = vector.extract_strided_slice %93 {offsets = [0, 128], sizes = [8, 128], strides = [1, 1]} : vector<8x384xf32> to vector<8x128xf32>
    %104 = arith.addf %102, %103 : vector<8x128xf32>
    %105 = arith.negf %104 : vector<8x128xf32>
    %106 = math.exp %105 : vector<8x128xf32>
    %cst_31 = arith.constant 1.000000e+00 : f32
    %107 = vector.broadcast %cst_31 : f32 to vector<8x128xf32>
    %108 = arith.addf %107, %106 : vector<8x128xf32>
    %109 = arith.divf %107, %108 : vector<8x128xf32>
    %110 = vector.extract_strided_slice %91 {offsets = [0, 256], sizes = [8, 128], strides = [1, 1]} : vector<8x384xf32> to vector<8x128xf32>
    %111 = vector.extract_strided_slice %93 {offsets = [0, 256], sizes = [8, 128], strides = [1, 1]} : vector<8x384xf32> to vector<8x128xf32>
    %112 = vector.broadcast %8 : vector<1x128xf32> to vector<8x128xf32>
    %113 = arith.addf %111, %112 : vector<8x128xf32>
    %114 = arith.mulf %101, %113 : vector<8x128xf32>
    %115 = arith.addf %110, %114 : vector<8x128xf32>
    %116 = math.tanh %115 : vector<8x128xf32>
    %cst_32 = arith.constant 1.000000e+00 : f32
    %117 = vector.broadcast %cst_32 : f32 to vector<8x128xf32>
    %118 = arith.subf %117, %109 : vector<8x128xf32>
    %119 = arith.mulf %118, %116 : vector<8x128xf32>
    %120 = arith.mulf %109, %82 : vector<8x128xf32>
    %121 = arith.addf %119, %120 : vector<8x128xf32>
    %122 = arith.index_cast %c2_i32 : i32 to index
    %c0_33 = arith.constant 0 : index
    %c0_34 = arith.constant 0 : index
    %123 = vector.load %arg7[%122, %c0_33, %c0_34] : memref<8x8x128xf32, #tpu.memory_space<vmem>>, vector<1x8x128xf32>
    %124 = vector.shape_cast %123 : vector<1x8x128xf32> to vector<8x128xf32>
    %125 = vector.shape_cast %121 : vector<8x128xf32> to vector<1x8x128xf32>
    tpu.vector_store %arg7[%122, %c0_33, %c0_34], %125 {strides = array<i32>} : memref<8x8x128xf32, #tpu.memory_space<vmem>>, vector<1x8x128xf32>,
    %126 = arith.addf %87, %121 : vector<8x128xf32>
    %c3_i32 = arith.constant 3 : i32
    %c8_i32_35 = arith.constant 8 : i32
    %127 = arith.muli %c3_i32, %c8_i32_35 : i32
    %128 = tpu.assume_multiple %127, 8 : i32
    %129 = arith.index_cast %128 : i32 to index
    %c0_36 = arith.constant 0 : index
    %130 = vector.load %arg9[%129, %c0_36] : memref<64x384xf32, #tpu.memory_space<vmem>>, vector<8x384xf32>
    %131 = arith.truncf %121 : vector<8x128xf32> to vector<8x128xbf16>
    %cst_37 = arith.constant dense<0.000000e+00> : vector<8x384xf32>
    %132 = tpu.matmul %131, %7, %cst_37 {dimension_numbers = #tpu.dot_dimension_numbers<[1], [0], [0], [1], [0, 0, 1, 1], [], []>} : vector<8x128xbf16>, vector<128x384xbf16>, vector<8x384xf32> -> vector<8x384xf32>
    %133 = vector.extract_strided_slice %130 {offsets = [0, 0], sizes = [8, 128], strides = [1, 1]} : vector<8x384xf32> to vector<8x128xf32>
    %134 = vector.extract_strided_slice %132 {offsets = [0, 0], sizes = [8, 128], strides = [1, 1]} : vector<8x384xf32> to vector<8x128xf32>
    %135 = arith.addf %133, %134 : vector<8x128xf32>
    %136 = arith.negf %135 : vector<8x128xf32>
    %137 = math.exp %136 : vector<8x128xf32>
    %cst_38 = arith.constant 1.000000e+00 : f32
    %138 = vector.broadcast %cst_38 : f32 to vector<8x128xf32>
    %139 = arith.addf %138, %137 : vector<8x128xf32>
    %140 = arith.divf %138, %139 : vector<8x128xf32>
    %141 = vector.extract_strided_slice %130 {offsets = [0, 128], sizes = [8, 128], strides = [1, 1]} : vector<8x384xf32> to vector<8x128xf32>
    %142 = vector.extract_strided_slice %132 {offsets = [0, 128], sizes = [8, 128], strides = [1, 1]} : vector<8x384xf32> to vector<8x128xf32>
    %143 = arith.addf %141, %142 : vector<8x128xf32>
    %144 = arith.negf %143 : vector<8x128xf32>
    %145 = math.exp %144 : vector<8x128xf32>
    %cst_39 = arith.constant 1.000000e+00 : f32
    %146 = vector.broadcast %cst_39 : f32 to vector<8x128xf32>
    %147 = arith.addf %146, %145 : vector<8x128xf32>
    %148 = arith.divf %146, %147 : vector<8x128xf32>
    %149 = vector.extract_strided_slice %130 {offsets = [0, 256], sizes = [8, 128], strides = [1, 1]} : vector<8x384xf32> to vector<8x128xf32>
    %150 = vector.extract_strided_slice %132 {offsets = [0, 256], sizes = [8, 128], strides = [1, 1]} : vector<8x384xf32> to vector<8x128xf32>
    %151 = vector.broadcast %8 : vector<1x128xf32> to vector<8x128xf32>
    %152 = arith.addf %150, %151 : vector<8x128xf32>
    %153 = arith.mulf %140, %152 : vector<8x128xf32>
    %154 = arith.addf %149, %153 : vector<8x128xf32>
    %155 = math.tanh %154 : vector<8x128xf32>
    %cst_40 = arith.constant 1.000000e+00 : f32
    %156 = vector.broadcast %cst_40 : f32 to vector<8x128xf32>
    %157 = arith.subf %156, %148 : vector<8x128xf32>
    %158 = arith.mulf %157, %155 : vector<8x128xf32>
    %159 = arith.mulf %148, %121 : vector<8x128xf32>
    %160 = arith.addf %158, %159 : vector<8x128xf32>
    %161 = arith.index_cast %c3_i32 : i32 to index
    %c0_41 = arith.constant 0 : index
    %c0_42 = arith.constant 0 : index
    %162 = vector.load %arg7[%161, %c0_41, %c0_42] : memref<8x8x128xf32, #tpu.memory_space<vmem>>, vector<1x8x128xf32>
    %163 = vector.shape_cast %162 : vector<1x8x128xf32> to vector<8x128xf32>
    %164 = vector.shape_cast %160 : vector<8x128xf32> to vector<1x8x128xf32>
    tpu.vector_store %arg7[%161, %c0_41, %c0_42], %164 {strides = array<i32>} : memref<8x8x128xf32, #tpu.memory_space<vmem>>, vector<1x8x128xf32>,
    %165 = arith.addf %126, %160 : vector<8x128xf32>
    %c4_i32 = arith.constant 4 : i32
    %c8_i32_43 = arith.constant 8 : i32
    %166 = arith.muli %c4_i32, %c8_i32_43 : i32
    %167 = tpu.assume_multiple %166, 8 : i32
    %168 = arith.index_cast %167 : i32 to index
    %c0_44 = arith.constant 0 : index
    %169 = vector.load %arg9[%168, %c0_44] : memref<64x384xf32, #tpu.memory_space<vmem>>, vector<8x384xf32>
    %170 = arith.truncf %160 : vector<8x128xf32> to vector<8x128xbf16>
    %cst_45 = arith.constant dense<0.000000e+00> : vector<8x384xf32>
    %171 = tpu.matmul %170, %7, %cst_45 {dimension_numbers = #tpu.dot_dimension_numbers<[1], [0], [0], [1], [0, 0, 1, 1], [], []>} : vector<8x128xbf16>, vector<128x384xbf16>, vector<8x384xf32> -> vector<8x384xf32>
    %172 = vector.extract_strided_slice %169 {offsets = [0, 0], sizes = [8, 128], strides = [1, 1]} : vector<8x384xf32> to vector<8x128xf32>
    %173 = vector.extract_strided_slice %171 {offsets = [0, 0], sizes = [8, 128], strides = [1, 1]} : vector<8x384xf32> to vector<8x128xf32>
    %174 = arith.addf %172, %173 : vector<8x128xf32>
    %175 = arith.negf %174 : vector<8x128xf32>
    %176 = math.exp %175 : vector<8x128xf32>
    %cst_46 = arith.constant 1.000000e+00 : f32
    %177 = vector.broadcast %cst_46 : f32 to vector<8x128xf32>
    %178 = arith.addf %177, %176 : vector<8x128xf32>
    %179 = arith.divf %177, %178 : vector<8x128xf32>
    %180 = vector.extract_strided_slice %169 {offsets = [0, 128], sizes = [8, 128], strides = [1, 1]} : vector<8x384xf32> to vector<8x128xf32>
    %181 = vector.extract_strided_slice %171 {offsets = [0, 128], sizes = [8, 128], strides = [1, 1]} : vector<8x384xf32> to vector<8x128xf32>
    %182 = arith.addf %180, %181 : vector<8x128xf32>
    %183 = arith.negf %182 : vector<8x128xf32>
    %184 = math.exp %183 : vector<8x128xf32>
    %cst_47 = arith.constant 1.000000e+00 : f32
    %185 = vector.broadcast %cst_47 : f32 to vector<8x128xf32>
    %186 = arith.addf %185, %184 : vector<8x128xf32>
    %187 = arith.divf %185, %186 : vector<8x128xf32>
    %188 = vector.extract_strided_slice %169 {offsets = [0, 256], sizes = [8, 128], strides = [1, 1]} : vector<8x384xf32> to vector<8x128xf32>
    %189 = vector.extract_strided_slice %171 {offsets = [0, 256], sizes = [8, 128], strides = [1, 1]} : vector<8x384xf32> to vector<8x128xf32>
    %190 = vector.broadcast %8 : vector<1x128xf32> to vector<8x128xf32>
    %191 = arith.addf %189, %190 : vector<8x128xf32>
    %192 = arith.mulf %179, %191 : vector<8x128xf32>
    %193 = arith.addf %188, %192 : vector<8x128xf32>
    %194 = math.tanh %193 : vector<8x128xf32>
    %cst_48 = arith.constant 1.000000e+00 : f32
    %195 = vector.broadcast %cst_48 : f32 to vector<8x128xf32>
    %196 = arith.subf %195, %187 : vector<8x128xf32>
    %197 = arith.mulf %196, %194 : vector<8x128xf32>
    %198 = arith.mulf %187, %160 : vector<8x128xf32>
    %199 = arith.addf %197, %198 : vector<8x128xf32>
    %200 = arith.index_cast %c4_i32 : i32 to index
    %c0_49 = arith.constant 0 : index
    %c0_50 = arith.constant 0 : index
    %201 = vector.load %arg7[%200, %c0_49, %c0_50] : memref<8x8x128xf32, #tpu.memory_space<vmem>>, vector<1x8x128xf32>
    %202 = vector.shape_cast %201 : vector<1x8x128xf32> to vector<8x128xf32>
    %203 = vector.shape_cast %199 : vector<8x128xf32> to vector<1x8x128xf32>
    tpu.vector_store %arg7[%200, %c0_49, %c0_50], %203 {strides = array<i32>} : memref<8x8x128xf32, #tpu.memory_space<vmem>>, vector<1x8x128xf32>,
    %204 = arith.addf %165, %199 : vector<8x128xf32>
    %c5_i32 = arith.constant 5 : i32
    %c8_i32_51 = arith.constant 8 : i32
    %205 = arith.muli %c5_i32, %c8_i32_51 : i32
    %206 = tpu.assume_multiple %205, 8 : i32
    %207 = arith.index_cast %206 : i32 to index
    %c0_52 = arith.constant 0 : index
    %208 = vector.load %arg9[%207, %c0_52] : memref<64x384xf32, #tpu.memory_space<vmem>>, vector<8x384xf32>
    %209 = arith.truncf %199 : vector<8x128xf32> to vector<8x128xbf16>
    %cst_53 = arith.constant dense<0.000000e+00> : vector<8x384xf32>
    %210 = tpu.matmul %209, %7, %cst_53 {dimension_numbers = #tpu.dot_dimension_numbers<[1], [0], [0], [1], [0, 0, 1, 1], [], []>} : vector<8x128xbf16>, vector<128x384xbf16>, vector<8x384xf32> -> vector<8x384xf32>
    %211 = vector.extract_strided_slice %208 {offsets = [0, 0], sizes = [8, 128], strides = [1, 1]} : vector<8x384xf32> to vector<8x128xf32>
    %212 = vector.extract_strided_slice %210 {offsets = [0, 0], sizes = [8, 128], strides = [1, 1]} : vector<8x384xf32> to vector<8x128xf32>
    %213 = arith.addf %211, %212 : vector<8x128xf32>
    %214 = arith.negf %213 : vector<8x128xf32>
    %215 = math.exp %214 : vector<8x128xf32>
    %cst_54 = arith.constant 1.000000e+00 : f32
    %216 = vector.broadcast %cst_54 : f32 to vector<8x128xf32>
    %217 = arith.addf %216, %215 : vector<8x128xf32>
    %218 = arith.divf %216, %217 : vector<8x128xf32>
    %219 = vector.extract_strided_slice %208 {offsets = [0, 128], sizes = [8, 128], strides = [1, 1]} : vector<8x384xf32> to vector<8x128xf32>
    %220 = vector.extract_strided_slice %210 {offsets = [0, 128], sizes = [8, 128], strides = [1, 1]} : vector<8x384xf32> to vector<8x128xf32>
    %221 = arith.addf %219, %220 : vector<8x128xf32>
    %222 = arith.negf %221 : vector<8x128xf32>
    %223 = math.exp %222 : vector<8x128xf32>
    %cst_55 = arith.constant 1.000000e+00 : f32
    %224 = vector.broadcast %cst_55 : f32 to vector<8x128xf32>
    %225 = arith.addf %224, %223 : vector<8x128xf32>
    %226 = arith.divf %224, %225 : vector<8x128xf32>
    %227 = vector.extract_strided_slice %208 {offsets = [0, 256], sizes = [8, 128], strides = [1, 1]} : vector<8x384xf32> to vector<8x128xf32>
    %228 = vector.extract_strided_slice %210 {offsets = [0, 256], sizes = [8, 128], strides = [1, 1]} : vector<8x384xf32> to vector<8x128xf32>
    %229 = vector.broadcast %8 : vector<1x128xf32> to vector<8x128xf32>
    %230 = arith.addf %228, %229 : vector<8x128xf32>
    %231 = arith.mulf %218, %230 : vector<8x128xf32>
    %232 = arith.addf %227, %231 : vector<8x128xf32>
    %233 = math.tanh %232 : vector<8x128xf32>
    %cst_56 = arith.constant 1.000000e+00 : f32
    %234 = vector.broadcast %cst_56 : f32 to vector<8x128xf32>
    %235 = arith.subf %234, %226 : vector<8x128xf32>
    %236 = arith.mulf %235, %233 : vector<8x128xf32>
    %237 = arith.mulf %226, %199 : vector<8x128xf32>
    %238 = arith.addf %236, %237 : vector<8x128xf32>
    %239 = arith.index_cast %c5_i32 : i32 to index
    %c0_57 = arith.constant 0 : index
    %c0_58 = arith.constant 0 : index
    %240 = vector.load %arg7[%239, %c0_57, %c0_58] : memref<8x8x128xf32, #tpu.memory_space<vmem>>, vector<1x8x128xf32>
    %241 = vector.shape_cast %240 : vector<1x8x128xf32> to vector<8x128xf32>
    %242 = vector.shape_cast %238 : vector<8x128xf32> to vector<1x8x128xf32>
    tpu.vector_store %arg7[%239, %c0_57, %c0_58], %242 {strides = array<i32>} : memref<8x8x128xf32, #tpu.memory_space<vmem>>, vector<1x8x128xf32>,
    %243 = arith.addf %204, %238 : vector<8x128xf32>
    %c6_i32 = arith.constant 6 : i32
    %c8_i32_59 = arith.constant 8 : i32
    %244 = arith.muli %c6_i32, %c8_i32_59 : i32
    %245 = tpu.assume_multiple %244, 8 : i32
    %246 = arith.index_cast %245 : i32 to index
    %c0_60 = arith.constant 0 : index
    %247 = vector.load %arg9[%246, %c0_60] : memref<64x384xf32, #tpu.memory_space<vmem>>, vector<8x384xf32>
    %248 = arith.truncf %238 : vector<8x128xf32> to vector<8x128xbf16>
    %cst_61 = arith.constant dense<0.000000e+00> : vector<8x384xf32>
    %249 = tpu.matmul %248, %7, %cst_61 {dimension_numbers = #tpu.dot_dimension_numbers<[1], [0], [0], [1], [0, 0, 1, 1], [], []>} : vector<8x128xbf16>, vector<128x384xbf16>, vector<8x384xf32> -> vector<8x384xf32>
    %250 = vector.extract_strided_slice %247 {offsets = [0, 0], sizes = [8, 128], strides = [1, 1]} : vector<8x384xf32> to vector<8x128xf32>
    %251 = vector.extract_strided_slice %249 {offsets = [0, 0], sizes = [8, 128], strides = [1, 1]} : vector<8x384xf32> to vector<8x128xf32>
    %252 = arith.addf %250, %251 : vector<8x128xf32>
    %253 = arith.negf %252 : vector<8x128xf32>
    %254 = math.exp %253 : vector<8x128xf32>
    %cst_62 = arith.constant 1.000000e+00 : f32
    %255 = vector.broadcast %cst_62 : f32 to vector<8x128xf32>
    %256 = arith.addf %255, %254 : vector<8x128xf32>
    %257 = arith.divf %255, %256 : vector<8x128xf32>
    %258 = vector.extract_strided_slice %247 {offsets = [0, 128], sizes = [8, 128], strides = [1, 1]} : vector<8x384xf32> to vector<8x128xf32>
    %259 = vector.extract_strided_slice %249 {offsets = [0, 128], sizes = [8, 128], strides = [1, 1]} : vector<8x384xf32> to vector<8x128xf32>
    %260 = arith.addf %258, %259 : vector<8x128xf32>
    %261 = arith.negf %260 : vector<8x128xf32>
    %262 = math.exp %261 : vector<8x128xf32>
    %cst_63 = arith.constant 1.000000e+00 : f32
    %263 = vector.broadcast %cst_63 : f32 to vector<8x128xf32>
    %264 = arith.addf %263, %262 : vector<8x128xf32>
    %265 = arith.divf %263, %264 : vector<8x128xf32>
    %266 = vector.extract_strided_slice %247 {offsets = [0, 256], sizes = [8, 128], strides = [1, 1]} : vector<8x384xf32> to vector<8x128xf32>
    %267 = vector.extract_strided_slice %249 {offsets = [0, 256], sizes = [8, 128], strides = [1, 1]} : vector<8x384xf32> to vector<8x128xf32>
    %268 = vector.broadcast %8 : vector<1x128xf32> to vector<8x128xf32>
    %269 = arith.addf %267, %268 : vector<8x128xf32>
    %270 = arith.mulf %257, %269 : vector<8x128xf32>
    %271 = arith.addf %266, %270 : vector<8x128xf32>
    %272 = math.tanh %271 : vector<8x128xf32>
    %cst_64 = arith.constant 1.000000e+00 : f32
    %273 = vector.broadcast %cst_64 : f32 to vector<8x128xf32>
    %274 = arith.subf %273, %265 : vector<8x128xf32>
    %275 = arith.mulf %274, %272 : vector<8x128xf32>
    %276 = arith.mulf %265, %238 : vector<8x128xf32>
    %277 = arith.addf %275, %276 : vector<8x128xf32>
    %278 = arith.index_cast %c6_i32 : i32 to index
    %c0_65 = arith.constant 0 : index
    %c0_66 = arith.constant 0 : index
    %279 = vector.load %arg7[%278, %c0_65, %c0_66] : memref<8x8x128xf32, #tpu.memory_space<vmem>>, vector<1x8x128xf32>
    %280 = vector.shape_cast %279 : vector<1x8x128xf32> to vector<8x128xf32>
    %281 = vector.shape_cast %277 : vector<8x128xf32> to vector<1x8x128xf32>
    tpu.vector_store %arg7[%278, %c0_65, %c0_66], %281 {strides = array<i32>} : memref<8x8x128xf32, #tpu.memory_space<vmem>>, vector<1x8x128xf32>,
    %282 = arith.addf %243, %277 : vector<8x128xf32>
    %c7_i32 = arith.constant 7 : i32
    %c8_i32_67 = arith.constant 8 : i32
    %283 = arith.muli %c7_i32, %c8_i32_67 : i32
    %284 = tpu.assume_multiple %283, 8 : i32
    %285 = arith.index_cast %284 : i32 to index
    %c0_68 = arith.constant 0 : index
    %286 = vector.load %arg9[%285, %c0_68] : memref<64x384xf32, #tpu.memory_space<vmem>>, vector<8x384xf32>
    %287 = arith.truncf %277 : vector<8x128xf32> to vector<8x128xbf16>
    %cst_69 = arith.constant dense<0.000000e+00> : vector<8x384xf32>
    %288 = tpu.matmul %287, %7, %cst_69 {dimension_numbers = #tpu.dot_dimension_numbers<[1], [0], [0], [1], [0, 0, 1, 1], [], []>} : vector<8x128xbf16>, vector<128x384xbf16>, vector<8x384xf32> -> vector<8x384xf32>
    %289 = vector.extract_strided_slice %286 {offsets = [0, 0], sizes = [8, 128], strides = [1, 1]} : vector<8x384xf32> to vector<8x128xf32>
    %290 = vector.extract_strided_slice %288 {offsets = [0, 0], sizes = [8, 128], strides = [1, 1]} : vector<8x384xf32> to vector<8x128xf32>
    %291 = arith.addf %289, %290 : vector<8x128xf32>
    %292 = arith.negf %291 : vector<8x128xf32>
    %293 = math.exp %292 : vector<8x128xf32>
    %cst_70 = arith.constant 1.000000e+00 : f32
    %294 = vector.broadcast %cst_70 : f32 to vector<8x128xf32>
    %295 = arith.addf %294, %293 : vector<8x128xf32>
    %296 = arith.divf %294, %295 : vector<8x128xf32>
    %297 = vector.extract_strided_slice %286 {offsets = [0, 128], sizes = [8, 128], strides = [1, 1]} : vector<8x384xf32> to vector<8x128xf32>
    %298 = vector.extract_strided_slice %288 {offsets = [0, 128], sizes = [8, 128], strides = [1, 1]} : vector<8x384xf32> to vector<8x128xf32>
    %299 = arith.addf %297, %298 : vector<8x128xf32>
    %300 = arith.negf %299 : vector<8x128xf32>
    %301 = math.exp %300 : vector<8x128xf32>
    %cst_71 = arith.constant 1.000000e+00 : f32
    %302 = vector.broadcast %cst_71 : f32 to vector<8x128xf32>
    %303 = arith.addf %302, %301 : vector<8x128xf32>
    %304 = arith.divf %302, %303 : vector<8x128xf32>
    %305 = vector.extract_strided_slice %286 {offsets = [0, 256], sizes = [8, 128], strides = [1, 1]} : vector<8x384xf32> to vector<8x128xf32>
    %306 = vector.extract_strided_slice %288 {offsets = [0, 256], sizes = [8, 128], strides = [1, 1]} : vector<8x384xf32> to vector<8x128xf32>
    %307 = vector.broadcast %8 : vector<1x128xf32> to vector<8x128xf32>
    %308 = arith.addf %306, %307 : vector<8x128xf32>
    %309 = arith.mulf %296, %308 : vector<8x128xf32>
    %310 = arith.addf %305, %309 : vector<8x128xf32>
    %311 = math.tanh %310 : vector<8x128xf32>
    %cst_72 = arith.constant 1.000000e+00 : f32
    %312 = vector.broadcast %cst_72 : f32 to vector<8x128xf32>
    %313 = arith.subf %312, %304 : vector<8x128xf32>
    %314 = arith.mulf %313, %311 : vector<8x128xf32>
    %315 = arith.mulf %304, %277 : vector<8x128xf32>
    %316 = arith.addf %314, %315 : vector<8x128xf32>
    %317 = arith.index_cast %c7_i32 : i32 to index
    %c0_73 = arith.constant 0 : index
    %c0_74 = arith.constant 0 : index
    %318 = vector.load %arg7[%317, %c0_73, %c0_74] : memref<8x8x128xf32, #tpu.memory_space<vmem>>, vector<1x8x128xf32>
    %319 = vector.shape_cast %318 : vector<1x8x128xf32> to vector<8x128xf32>
    %320 = vector.shape_cast %316 : vector<8x128xf32> to vector<1x8x128xf32>
    tpu.vector_store %arg7[%317, %c0_73, %c0_74], %320 {strides = array<i32>} : memref<8x8x128xf32, #tpu.memory_space<vmem>>, vector<1x8x128xf32>,
    %321 = arith.addf %282, %316 : vector<8x128xf32>
    %c8_i32_75 = arith.constant 8 : i32
    %cst_76 = arith.constant 1.250000e-01 : f32
    %322 = vector.broadcast %cst_76 : f32 to vector<8x128xf32>
    %323 = arith.mulf %321, %322 : vector<8x128xf32>
    %324 = arith.truncf %323 : vector<8x128xf32> to vector<8x128xbf16>
    %c0_77 = arith.constant 0 : index
    %c0_78 = arith.constant 0 : index
    %325 = vector.load %arg5[%c0_77, %c0_78] : memref<128x128xbf16, #tpu.memory_space<vmem>>, vector<128x128xbf16>
    %cst_79 = arith.constant dense<0.000000e+00> : vector<8x128xf32>
    %326 = tpu.matmul %324, %325, %cst_79 {dimension_numbers = #tpu.dot_dimension_numbers<[1], [0], [0], [1], [0, 0, 1, 1], [], []>} : vector<8x128xbf16>, vector<128x128xbf16>, vector<8x128xf32> -> vector<8x128xf32>
    %c0_80 = arith.constant 0 : index
    %c0_81 = arith.constant 0 : index
    %327 = vector.load %arg6[%c0_80, %c0_81] : memref<1x128xf32, #tpu.memory_space<vmem>>, vector<1x128xf32>
    %328 = vector.broadcast %327 : vector<1x128xf32> to vector<8x128xf32>
    %329 = arith.addf %326, %328 : vector<8x128xf32>
    %330 = math.tanh %329 : vector<8x128xf32>
    %c0_82 = arith.constant 0 : index
    %c0_83 = arith.constant 0 : index
    %331 = vector.load %arg8[%c0_82, %c0_83] : memref<8x128xf32, #tpu.memory_space<vmem>>, vector<8x128xf32>
    tpu.vector_store %arg8[%c0_82, %c0_83], %330 {strides = array<i32>} : memref<8x128xf32, #tpu.memory_space<vmem>>, vector<8x128xf32>,
    return
  }
}

</mosaic_0001>

<bundles_post_ra>
// kernel: encoder_rnn_forward.1
= control target key start
LH: loop header
LB: loop body
LE: loop exit
PB: predicated region body
PF: predicated region fallthrough
CT: control target
= control target key end

     0   :  { %14 = vsyncpa [#allocation4], 0  ;;  %s2906_s0 = inlined_call_operand.vmem [shape: bf16[64,128], index: 0, kind: input, shape index: {}]   ;;  %s2907_s1 = inlined_call_operand.vmem [shape: bf16[128,384], index: 1, kind: input, shape index: {}]   ;;  %s2908_s2 = inlined_call_operand.vmem [shape: f32[1,384], index: 2, kind: input, shape index: {}]   ;;  %s2909_s3 = inlined_call_operand.hbm [shape: bf16[128,384], index: 3, kind: input, shape index: {}]   ;;  %s2910_s4 = inlined_call_operand.vmem [shape: f32[1,128], index: 4, kind: input, shape index: {}]   ;;  %s2911_s5 = inlined_call_operand.hbm [shape: bf16[128,128], index: 5, kind: input, shape index: {}]   ;;  %s2912_s6 = inlined_call_operand.vmem [shape: f32[1,128], index: 6, kind: input, shape index: {}]   ;;  %s2913_s7 = inlined_call_operand.vmem [shape: f32[8,8,128], index: 7, kind: output, shape index: {0}]   ;;  %s2914_s8 = inlined_call_operand.vmem [shape: f32[8,128], index: 8, kind: output, shape index: {1}]  }
   0x1   :  { %15 = vsyncpa [#allocation6], 0  ;;  %s2247_s27 = smov [#allocation3]   ;;  %s2199_s9 = scalar_lea.hbm %s2909_s3, 3072 }
   0x2   :  { %s27_s28 = sshll.u32 %s2247_s27, 4  ;;  %p2200_p0 = scmp.ne.s32.totalorder %s2909_s3, %s2199_s9  ;;  %s28_s28 = int_to_ptr.vmem [resolvable:$true] %s27_s28 }
   0x3   :  { %p2203_p1 = scmp.lt.u32.totalorder %s2199_s9, %s2909_s3 }
   0x5   :  { %p2205_p2 = pnand %p2203_p1, %p2200_p0 }
   0x7   :  { %2208 = shalt.err (!%p2205_p2)
}
   0x8   :  { %s2209_s14 = scalar_lea.vmem %s28_s28, 3072  ;;  %p2214_p4 = scmp.lt.s32.totalorder %s28_s28, %s28_s28 }
   0x9   :  { %p2210_p3 = scmp.ne.s32.totalorder %s28_s28, %s2209_s14  ;;  %p2215_p5 = scmp.lt.s32.totalorder %s2209_s14, %s2209_s14 }
   0xb   :  { %p2216_p6 = por %p2215_p5, %p2214_p4 }
   0xd   :  { %p2217_p7 = pnand %p2216_p6, %p2210_p3 }
   0xf   :  { %2220 = shalt.err (!%p2217_p7)
}
  0x10   :  { %s2248_s15 = smov 192   ;;  %s2249_s16 = smov 12  }
  0x11   :  { %33 = dma.hbm_to_vmem [thread:$0]  %s2909_s3, 3072, %s28_s28, [#allocation4], %s2248_s15, %s2248_s15, %s2249_s16  }
  0x12   :  { %s2250_s19 = smov [#allocation5]   ;;  %s2221_s23 = scalar_lea.hbm %s2911_s5, 1024 }
  0x13   :  { %s41_s20 = sshll.u32 %s2250_s19, 4  ;;  %p2222_p8 = scmp.ne.s32.totalorder %s2911_s5, %s2221_s23  ;;  %s42_s20 = int_to_ptr.vmem [resolvable:$true] %s41_s20 }
  0x14   :  { %p2225_p9 = scmp.lt.u32.totalorder %s2221_s23, %s2911_s5 }
  0x16   :  { %p2227_p10 = pnand %p2225_p9, %p2222_p8 }
  0x18   :  { %2230 = shalt.err (!%p2227_p10)
}
  0x19   :  { %s2231_s29 = scalar_lea.vmem %s42_s20, 1024  ;;  %p2236_p12 = scmp.lt.s32.totalorder %s42_s20, %s42_s20 }
  0x1a   :  { %p2232_p11 = scmp.ne.s32.totalorder %s42_s20, %s2231_s29  ;;  %p2237_p13 = scmp.lt.s32.totalorder %s2231_s29, %s2231_s29 }
  0x1c   :  { %p2238_p0 = por %p2237_p13, %p2236_p12 }
  0x1e   :  { %p2239_p1 = pnand %p2238_p0, %p2232_p11 }
  0x20   :  { %2242 = shalt.err (!%p2239_p1)
}
  0x21   :  { %s2251_s3 = smov 64   ;;  %s2252_s28 = smov 4  }
  0x22   :  { %47 = dma.hbm_to_vmem [thread:$0]  %s2911_s5, 1024, %s42_s20, [#allocation6], %s2251_s3, %s2251_s3, %s2252_s28  }
  0x23   :  { %2243 = dma.done.wait [#allocation4], 3072  }
  0x24   :  { %2244 = vsyncadd [#allocation4], 4294964224 }
  0x25   :  { %2245 = dma.done.wait [#allocation6], 1024  }
  0x26   :  { %2246 = vsyncadd [#allocation6], 4294966272  ;;  %v2915_v0 = vmov 0   ;;  %v2020_v1 = vld [vmem:[%s2907_s1 + $0x4] ss:$12 sps:$4 sm:$0xff]   ;;  %v2055_v31 = vld [vmem:[%s2906_s0 + $0x8] sm:$0xff]   ;;  %v99_v54 = vlaneseq }
  0x27   :  { %298 = vmatprep.mubr.bf16.mxu0 %v2915_v0  ;;  %v2022_v2 = vld [vmem:[%s2907_s1] ss:$12 sps:$4 sm:$0xff]   ;;  %266 = vmatprep.subr.bf16.mxu0 %v2020_v1  ;;  %v2023_v3 = vld [vmem:[%s2907_s1 + $0x1c] ss:$12 sps:$4 sm:$0xff]   ;;  %v2025_v4 = vld [vmem:[%s2907_s1 + $0x18] ss:$12 sps:$4 sm:$0xff]  }
  0x28   :  { %267 = vmatpush1.bf16.msra.mxu0 %v2022_v2  ;;  %v2026_v5 = vld [vmem:[%s2907_s1 + $0x34] ss:$12 sps:$4 sm:$0xff]   ;;  %v2028_v6 = vld [vmem:[%s2907_s1 + $0x30] ss:$12 sps:$4 sm:$0xff]   ;;  %v2029_v7 = vld [vmem:[%s2907_s1 + $0x4c] ss:$12 sps:$4 sm:$0xff]  }
  0x29   :  { %268 = vmatprep.subr.bf16.mxu0 %v2023_v3  ;;  %v2040_v8 = vld [vmem:[%s2907_s1 + $0x8] ss:$12 sps:$4 sm:$0xff]   ;;  %v2032_v10 = vld [vmem:[%s2907_s1 + $0x64] ss:$12 sps:$4 sm:$0xff]   ;;  %v2044_v11 = vld [vmem:[%s2907_s1 + $0x20] ss:$12 sps:$4 sm:$0xff]  }
  0x2a   :  { %v2031_v9 = vld [vmem:[%s2907_s1 + $0x48] ss:$12 sps:$4 sm:$0xff]   ;;  %1807 = vmatprep.subr.bf16.mxu1 %v2040_v8  ;;  %v2046_v12 = vld [vmem:[%s2906_s0] sm:$0xff]   ;;  %v2051_v16 = vld [vmem:[%s2907_s1 + $0x50] ss:$12 sps:$4 sm:$0xff]   ;;  %v2917_v36 = vmov 0.0  }
  0x2b   :  { %1808 = vmatpush3.bf16.msra.mxu1 %v2040_v8  ;;  %v2047_v13 = vld [vmem:[%s2907_s1 + $0x38] ss:$12 sps:$4 sm:$0xff]   ;;  %v2034_v14 = vld [vmem:[%s2907_s1 + $0x60] ss:$12 sps:$4 sm:$0xff]   ;;  %1823 = vmatprep.mubr.bf16.mxu1 %v2046_v12  ;;  %v2035_v15 = vld [vmem:[%s2907_s1 + $0x7c] ss:$12 sps:$4 sm:$0xff]  }
  0x2c   :  { %269 = vmatpush1.bf16.msra.mxu0 %v2025_v4  ;;  %1809 = vmatprep.subr.bf16.mxu1 %v2044_v11  ;;  %v2037_v17 = vld [vmem:[%s2907_s1 + $0x78] ss:$12 sps:$4 sm:$0xff]   ;;  %v2038_v18 = vld [vmem:[%s2907_s1 + $0x94] ss:$12 sps:$4 sm:$0xff]   ;;  %v2041_v20 = vld [vmem:[%s2907_s1 + $0x90] ss:$12 sps:$4 sm:$0xff]  }
  0x2d   :  { %270 = vmatprep.subr.bf16.mxu0 %v2026_v5  ;;  %v2056_v19 = vld [vmem:[%s2907_s1 + $0x68] ss:$12 sps:$4 sm:$0xff]   ;;  %v2042_v21 = vld [vmem:[%s2907_s1 + $0xac] ss:$12 sps:$4 sm:$0xff]   ;;  %v2395_v24 = vld [vmem:[#allocation3 + $0x4] ss:$12 sps:$4 sm:$0xff]  }
  0x2e   :  { %v2060_v22 = vld [vmem:[%s2907_s1 + $0x80] ss:$12 sps:$4 sm:$0xff]   ;;  %v2045_v23 = vld [vmem:[%s2907_s1 + $0xa8] ss:$12 sps:$4 sm:$0xff]   ;;  %v2065_v25 = vld [vmem:[%s2907_s1 + $0x98] ss:$12 sps:$4 sm:$0xff]  }
  0x2f   :  { %1810 = vmatpush3.bf16.msra.mxu1 %v2044_v11  ;;  %v2400_v26 = vld [vmem:[#allocation3] ss:$12 sps:$4 sm:$0xff]   ;;  %v2403_v27 = vld [vmem:[#allocation3 + $0x1c] ss:$12 sps:$4 sm:$0xff]   ;;  %v2409_v29 = vld [vmem:[#allocation3 + $0x18] ss:$12 sps:$4 sm:$0xff]  }
  0x30   :  { %271 = vmatpush1.bf16.msra.mxu0 %v2028_v6  ;;  %1811 = vmatprep.subr.bf16.mxu1 %v2047_v13  ;;  %v2069_v28 = vld [vmem:[%s2907_s1 + $0xb0] ss:$12 sps:$4 sm:$0xff]   ;;  %v2413_v30 = vld [vmem:[#allocation3 + $0x34] ss:$12 sps:$4 sm:$0xff]   ;;  %v2422_v33 = vld [vmem:[#allocation3 + $0x4c] ss:$12 sps:$4 sm:$0xff]  }
  0x31   :  { %272 = vmatprep.subr.bf16.mxu0 %v2029_v7  ;;  %v2419_v32 = vld [vmem:[#allocation3 + $0x30] ss:$12 sps:$4 sm:$0xff]   ;;  %v2424_v34 = vld [vmem:[#allocation3 + $0x48] ss:$12 sps:$4 sm:$0xff]   ;;  %v2436_v39 = vld [vmem:[#allocation3 + $0x20] ss:$12 sps:$4 sm:$0xff]  }
  0x32   :  { %v2064_v35 = vld [vmem:[%s2906_s0 + $0x10] sm:$0xff]   ;;  %v2442_v40 = vld [vmem:[#allocation3 + $0x60] ss:$12 sps:$4 sm:$0xff]   ;;  %v2445_v41 = vld [vmem:[#allocation3 + $0x7c] ss:$12 sps:$4 sm:$0xff]   ;;  %vm2255_vm0 = vmmov 0  }
  0x33   :  { %1812 = vmatpush3.bf16.msra.mxu1 %v2047_v13  ;;  %v2430_v37 = vld [vmem:[#allocation3 + $0x8] ss:$12 sps:$4 sm:$0xff]   ;;  %v2432_v38 = vld [vmem:[#allocation3 + $0x64] ss:$12 sps:$4 sm:$0xff]   ;;  %v2073_v43 = vld [vmem:[%s2906_s0 + $0x18] sm:$0xff]   ;;  %v100_v55 = vshrl.u32 %v99_v54, 7 }
  0x34   :  { %273 = vmatpush1.bf16.msra.mxu0 %v2031_v9  ;;  %1813 = vmatprep.subr.bf16.mxu1 %v2051_v16  ;;  %v2448_v42 = vld [vmem:[#allocation3 + $0x38] ss:$12 sps:$4 sm:$0xff]   ;;  %v2459_v45 = vld [vmem:[#allocation3 + $0x94] ss:$12 sps:$4 sm:$0xff]   ;;  %v2462_v46 = vld [vmem:[#allocation3 + $0x50] ss:$12 sps:$4 sm:$0xff]  }
  0x35   :  { %274 = vmatprep.subr.bf16.mxu0 %v2032_v10  ;;  %v2455_v44 = vld [vmem:[#allocation3 + $0x78] ss:$12 sps:$4 sm:$0xff]   ;;  %v2468_v47 = vld [vmem:[#allocation3 + $0x90] ss:$12 sps:$4 sm:$0xff]   ;;  %v2474_v49 = vld [vmem:[#allocation3 + $0x68] ss:$12 sps:$4 sm:$0xff]  }
  0x36   :  { %v2471_v48 = vld [vmem:[#allocation3 + $0xac] ss:$12 sps:$4 sm:$0xff]   ;;  %v2478_v50 = vld [vmem:[#allocation3 + $0xa8] ss:$12 sps:$4 sm:$0xff]   ;;  %v2497_v53 = vld [vmem:[#allocation3 + $0xb0] ss:$12 sps:$4 sm:$0xff]  }
  0x37   :  { %1814 = vmatpush3.bf16.msra.mxu1 %v2051_v16  ;;  %v2483_v51 = vld [vmem:[#allocation3 + $0x80] ss:$12 sps:$4 sm:$0xff]   ;;  %v2489_v52 = vld [vmem:[#allocation3 + $0x98] ss:$12 sps:$4 sm:$0xff]   ;;  %v101_v56 = vsub.s32 0, %v100_v55  ;;  %v105_v58 = vsub.s32 1, %v100_v55 }
  0x38   :  { %275 = vmatpush1.bf16.msra.mxu0 %v2034_v14  ;;  %1815 = vmatprep.subr.bf16.mxu1 %v2056_v19  ;;  %v97_v57 = vld [vmem:[%s2908_s2] sm:$0x7]  ;;  %v109_v3 = vsub.s32 2, %v100_v55 }
  0x39   :  { %276 = vmatprep.subr.bf16.mxu0 %v2035_v15  ;;  %v102_v60 = vrot.slane %v97_v57, %v101_v56  ;;  %v106_v62 = vrot.slane %v97_v57, %v105_v58 }
  0x3a   :  { %v2542_v5 = vrot.slane %v97_v57, %v109_v3 }
  0x3b   :  { %1816 = vmatpush3.bf16.msra.mxu1 %v2056_v19 }
  0x3c   :  { %277 = vmatpush1.bf16.msra.mxu0 %v2037_v17  ;;  %1817 = vmatprep.subr.bf16.mxu1 %v2060_v22 }
  0x3d   :  { %278 = vmatprep.subr.bf16.mxu0 %v2038_v18 }
  0x3f   :  { %1818 = vmatpush3.bf16.msra.mxu1 %v2060_v22 }
  0x40   :  { %279 = vmatpush1.bf16.msra.mxu0 %v2041_v20  ;;  %1819 = vmatprep.subr.bf16.mxu1 %v2065_v25 }
  0x41   :  { %280 = vmatprep.subr.bf16.mxu0 %v2042_v21 }
  0x43   :  { %1820 = vmatpush3.bf16.msra.mxu1 %v2065_v25 }
  0x44   :  { %281 = vmatpush1.bf16.msra.mxu0 %v2045_v23  ;;  %1821 = vmatprep.subr.bf16.mxu1 %v2069_v28 }
  0x45   :  { %595 = vmatprep.subr.bf16.mxu0 %v2395_v24 }
  0x47   :  { %299 = vmatmul.mubr.bf16.vlgmr.msra.gmra.mrb[0].mxu0 %v2046_v12  ;;  %1822 = vmatpush3.bf16.msra.mxu1 %v2069_v28 }
  0x48   :  { %596 = vmatpush1.bf16.msra.mxu0 %v2400_v26  ;;  %308 = vmatprep.mubr.bf16.mxu0 %v2915_v0 }
  0x49   :  { %597 = vmatprep.subr.bf16.mxu0 %v2403_v27  ;;  %1831 = vmatprep.subr.bf16.mxu1 %v2917_v36 }
  0x4a   :  { %1824 = vmatmul.mubr.bf16.vlgmr.msra.gmra.mrb[0].mxu1 %v2055_v31 }
  0x4b   :  { %1832 = vmatpush3.bf16.msra.mxu1 %v2430_v37  ;;  %1827 = vmatprep.mubr.bf16.mxu1 %v2064_v35 }
  0x4c   :  { %598 = vmatpush1.bf16.msra.mxu0 %v2409_v29  ;;  %1833 = vmatprep.subr.bf16.mxu1 %v2917_v36 }
  0x4d   :  { %599 = vmatprep.subr.bf16.mxu0 %v2413_v30 }
  0x4f   :  { %309 = vmatmul.mubr.bf16.gmra.mrb[4].mxu0 %v2055_v31  ;;  %1834 = vmatpush3.bf16.msra.mxu1 %v2436_v39 }
  0x50   :  { %600 = vmatpush1.bf16.msra.mxu0 %v2419_v32  ;;  %318 = vmatprep.mubr.bf16.mxu0 %v2915_v0 }
  0x51   :  { %601 = vmatprep.subr.bf16.mxu0 %v2422_v33  ;;  %1835 = vmatprep.subr.bf16.mxu1 %v2917_v36 }
  0x52   :  { %1828 = vmatmul.mubr.bf16.gmra.mrb[4].mxu1 %v2073_v43 }
  0x53   :  { %1836 = vmatpush3.bf16.msra.mxu1 %v2448_v42  ;;  %1847 = vmatprep.mubr.msk.bf16.mxu1 %vm2255_vm0, %v2917_v36 }
  0x54   :  { %602 = vmatpush1.bf16.msra.mxu0 %v2424_v34  ;;  %1837 = vmatprep.subr.bf16.mxu1 %v2917_v36 }
  0x55   :  { %603 = vmatprep.subr.bf16.mxu0 %v2432_v38 }
  0x57   :  { %319 = vmatmul.mubr.bf16.gmra.mrb[8].mxu0 %v2064_v35  ;;  %1838 = vmatpush3.bf16.msra.mxu1 %v2462_v46 }
  0x58   :  { %604 = vmatpush1.bf16.msra.mxu0 %v2442_v40  ;;  %328 = vmatprep.mubr.bf16.mxu0 %v2915_v0 }
  0x59   :  { %605 = vmatprep.subr.bf16.mxu0 %v2445_v41  ;;  %1839 = vmatprep.subr.bf16.mxu1 %v2917_v36 }
  0x5b   :  { %1840 = vmatpush3.bf16.msra.mxu1 %v2474_v49 }
  0x5c   :  { %606 = vmatpush1.bf16.msra.mxu0 %v2455_v44  ;;  %1841 = vmatprep.subr.bf16.mxu1 %v2917_v36 }
  0x5d   :  { %607 = vmatprep.subr.bf16.mxu0 %v2459_v45 }
  0x5f   :  { %329 = vmatmul.mubr.bf16.gmra.mrb[12].mxu0 %v2073_v43  ;;  %1842 = vmatpush3.bf16.msra.mxu1 %v2483_v51 }
  0x60   :  { %608 = vmatpush1.bf16.msra.mxu0 %v2468_v47  ;;  %627 = vmatprep.mubr.bf16.mxu0 %v2915_v0 }
  0x61   :  { %609 = vmatprep.subr.bf16.mxu0 %v2471_v48  ;;  %1843 = vmatprep.subr.bf16.mxu1 %v2917_v36 }
  0x63   :  { %1844 = vmatpush3.bf16.msra.mxu1 %v2489_v52 }
  0x64   :  { %610 = vmatpush1.bf16.msra.mxu0 %v2478_v50  ;;  %1845 = vmatprep.subr.bf16.mxu1 %v2917_v36 }
  0x65   :  { %713 = vmatprep.subr.bf16.mxu0 %v2395_v24 }
  0x67   :  { %628 = vmatmul.mubr.bf16.vlgmr.msra.gmra.mrb[16].mxu0 %v2915_v0  ;;  %1846 = vmatpush3.bf16.msra.mxu1 %v2497_v53 }
  0x68   :  { %714 = vmatpush1.bf16.msra.mxu0 %v2400_v26  ;;  %745 = vmatprep.mubr.bf16.mxu0 %v2915_v0 }
  0x69   :  { %715 = vmatprep.subr.bf16.mxu0 %v2403_v27  ;;  %1851 = vmatprep.subr.bf16.mxu1 %v2917_v36 }
  0x6a   :  { %1848 = vmatmul.mubr.bf16.vlgmr.msra.gmra.mrb[8].mxu1 %v2915_v0 }
  0x6b   :  { %1852 = vmatpush3.bf16.msra.mxu1 %v2430_v37  ;;  %1867 = vmatprep.mubr.msk.bf16.mxu1 %vm2255_vm0, %v2917_v36 }
  0x6c   :  { %716 = vmatpush1.bf16.msra.mxu0 %v2409_v29  ;;  %1853 = vmatprep.subr.bf16.mxu1 %v2917_v36 }
  0x6d   :  { %717 = vmatprep.subr.bf16.mxu0 %v2413_v30 }
  0x6f   :  { %1854 = vmatpush3.bf16.msra.mxu1 %v2436_v39 }
  0x70   :  { %718 = vmatpush1.bf16.msra.mxu0 %v2419_v32  ;;  %1855 = vmatprep.subr.bf16.mxu1 %v2917_v36 }
  0x71   :  { %719 = vmatprep.subr.bf16.mxu0 %v2422_v33 }
  0x73   :  { %1856 = vmatpush3.bf16.msra.mxu1 %v2448_v42 }
  0x74   :  { %720 = vmatpush1.bf16.msra.mxu0 %v2424_v34  ;;  %1857 = vmatprep.subr.bf16.mxu1 %v2917_v36 }
  0x75   :  { %721 = vmatprep.subr.bf16.mxu0 %v2432_v38 }
  0x77   :  { %1858 = vmatpush3.bf16.msra.mxu1 %v2462_v46 }
  0x78   :  { %722 = vmatpush1.bf16.msra.mxu0 %v2442_v40  ;;  %1859 = vmatprep.subr.bf16.mxu1 %v2917_v36 }
  0x79   :  { %723 = vmatprep.subr.bf16.mxu0 %v2445_v41 }
  0x7b   :  { %1860 = vmatpush3.bf16.msra.mxu1 %v2474_v49 }
  0x7c   :  { %724 = vmatpush1.bf16.msra.mxu0 %v2455_v44  ;;  %1861 = vmatprep.subr.bf16.mxu1 %v2917_v36 }
  0x7d   :  { %725 = vmatprep.subr.bf16.mxu0 %v2459_v45 }
  0x7f   :  { %1862 = vmatpush3.bf16.msra.mxu1 %v2483_v51 }
  0x80   :  { %726 = vmatpush1.bf16.msra.mxu0 %v2468_v47  ;;  %1863 = vmatprep.subr.bf16.mxu1 %v2917_v36 }
  0x81   :  { %727 = vmatprep.subr.bf16.mxu0 %v2471_v48 }
  0x83   :  { %1864 = vmatpush3.bf16.msra.mxu1 %v2489_v52 }
  0x84   :  { %728 = vmatpush1.bf16.msra.mxu0 %v2478_v50  ;;  %1865 = vmatprep.subr.bf16.mxu1 %v2917_v36 }
  0x85   :  { %826 = vmatprep.subr.bf16.mxu0 %v2395_v24 }
  0x87   :  { %1866 = vmatpush3.bf16.msra.mxu1 %v2497_v53 }
  0x88   :  { %1871 = vmatprep.subr.bf16.mxu1 %v2917_v36 }
 0x11a   :  { %v300_v59 = vpop.f32.mrb[0].mxu0 }
 0x11b   :  { %v302_v61 = vpop.f32.mrb[1].mxu0 }
 0x11c   :  { %v304_v63 = vpop.f32.mrb[2].mxu0 }
 0x11d   :  { %v2538_v1 = vadd.f32 %v304_v63, %v102_v60  ;;  %v306_v2 = vpop.f32.mrb[3].mxu0  ;;  %v1825_v11 = vpop.f32.mrb[0].mxu1 }
 0x11e   :  { %v2540_v4 = vadd.f32 %v306_v2, %v106_v62  ;;  %v2551_v14 = vadd.f32 %v1825_v11, %v2542_v5  ;;  %v373_v15 = vpop.f32.mrb[1].mxu1 }
 0x11f   :  { %v1826_v17 = vpop.f32.mrb[2].mxu1 }
 0x120   :  { %v2556_v18 = vadd.f32 %v1826_v17, %v2542_v5  ;;  %v376_v19 = vpop.f32.mrb[3].mxu1 }
 0x121   :  { %v2559_v20 = vadd.f32 %v376_v19, %v2542_v5 }
 0x122   :  { %v310_v6 = vpop.f32.mrb[4].mxu0 }
 0x123   :  { %v2544_v7 = vadd.f32 %v310_v6, %v102_v60  ;;  %v312_v8 = vpop.f32.mrb[5].mxu0 }
 0x124   :  { %v2546_v9 = vadd.f32 %v312_v8, %v106_v62  ;;  %v314_v10 = vpop.f32.mrb[6].mxu0 }
 0x125   :  { %v2548_v12 = vadd.f32 %v314_v10, %v102_v60  ;;  %v316_v13 = vpop.f32.mrb[7].mxu0  ;;  %v1829_v31 = vpop.f32.mrb[4].mxu1 }
 0x126   :  { %v2553_v16 = vadd.f32 %v316_v13, %v106_v62  ;;  %v2568_v54 = vadd.f32 %v1829_v31, %v2542_v5  ;;  %v389_v55 = vpop.f32.mrb[5].mxu1 }
 0x127   :  { %v2573_v57 = vadd.f32 %v389_v55, %v2542_v5  ;;  %v1830_v58 = vpop.f32.mrb[6].mxu1 }
 0x128   :  { %2919 = vst [vmem:[#allocation9_spill] sm:$0xff] %v2568_v54  ;;  %v2576_v63 = vadd.f32 %v1830_v58, %v2542_v5  ;;  %v392_v2 = vpop.f32.mrb[7].mxu1 }
 0x129   :  { %v2579_v3 = vadd.f32 %v392_v2, %v2542_v5 }
 0x12a   :  { %v320_v21 = vpop.f32.mrb[8].mxu0  ;;  %2920 = vst [vmem:[#allocation10_spill] sm:$0xff] %v2576_v63 }
 0x12b   :  { %v2561_v22 = vadd.f32 %v320_v21, %v102_v60  ;;  %v322_v23 = vpop.f32.mrb[9].mxu0 }
 0x12c   :  { %v2563_v25 = vadd.f32 %v322_v23, %v106_v62  ;;  %v324_v28 = vpop.f32.mrb[10].mxu0  ;;  %v301_v23 = vadd.f32 %v300_v59, %v102_v60  ;;  %v2592_v59 = vld [vmem:[%s2910_s4] ss:$0 sm:$0xff] }
 0x12d   :  { %v2565_v35 = vadd.f32 %v324_v28, %v102_v60  ;;  %v326_v43 = vpop.f32.mrb[11].mxu0  ;;  %v303_v28 = vadd.f32 %v302_v61, %v106_v62 }
 0x12e   :  { %v2570_v56 = vadd.f32 %v326_v43, %v106_v62 }
 0x132   :  { %v330_v6 = vpop.f32.mrb[12].mxu0 }
 0x133   :  { %v2581_v8 = vadd.f32 %v330_v6, %v102_v60  ;;  %v332_v10 = vpop.f32.mrb[13].mxu0 }
 0x134   :  { %v2583_v11 = vadd.f32 %v332_v10, %v106_v62  ;;  %v334_v13 = vpop.f32.mrb[14].mxu0 }
 0x135   :  { %v2585_v17 = vadd.f32 %v334_v13, %v102_v60  ;;  %v336_v19 = vpop.f32.mrb[15].mxu0 }
 0x136   :  { %2921 = vst [vmem:[#allocation11_spill] sm:$0xff] %v2583_v11  ;;  %v2587_v21 = vadd.f32 %v336_v19, %v106_v62 }
 0x137   :  { %2922 = vst [vmem:[#allocation12_spill] sm:$0xff] %v2585_v17 }
 0x13a   :  { %v629_v31 = vpop.f32.mrb[16].mxu0 }
 0x13b   :  { %v676_v43 = vadd.f32 %v629_v31, %v301_v23  ;;  %v631_v55 = vpop.f32.mrb[17].mxu0 }
 0x13c   :  { %v683_v58 = vadd.f32 %v631_v55, %v303_v28  ;;  %v633_v2 = vpop.f32.mrb[18].mxu0 }
 0x13d   :  { %v1681_v0 = vmul.f32 -1.442695, %v676_v43  ;;  %v634_v36 = vpop.f32.mrb[19].mxu0  ;;  %v670_v63 = vpop.f32.mrb[8].mxu1 }
 0x13e   :  { %v1682_v6 = vmul.f32 -1.442695, %v683_v58  ;;  %v1849_v10 = vpop.f32.mrb[9].mxu1  ;;  %v696_v61 = vadd.f32 %v2592_v59, %v670_v63 }
 0x13f   :  { %2096 = vpow2.f32 %v1681_v0  ;;  %v673_v54 = vpop.f32.mrb[10].mxu1  ;;  %v374_v0 = vadd.f32 %v373_v15, %v2542_v5  ;;  %v2923_v5 = vmov 0.0   ;;  %v2924_v15 = vmov 0  }
 0x140   :  { %2098 = vpow2.f32 %v1682_v6  ;;  %v1850_v13 = vpop.f32.mrb[11].mxu1 }
 0x149   :  { %v2097_v17 = vpop.eup %2096 }
 0x14a   :  { %v680_v11 = vadd.f32 1.0, %v2097_v17  ;;  %v2099_v19 = vpop.eup %2098 }
 0x14b   :  { %v687_v60 = vadd.f32 1.0, %v2099_v19 }
 0x14c   :  { %2100 = vrcp.f32 %v680_v11 }
 0x14d   :  { %2102 = vrcp.f32 %v687_v60 }
 0x156   :  { %v2101_v36 = vpop.eup %2100 }
 0x157   :  { %v697_v62 = vmul.f32 %v2101_v36, %v696_v61  ;;  %v2103_v54 = vpop.eup %2102 }
 0x158   :  { %v700_v28 = vsub.f32 1.0, %v2103_v54  ;;  %v702_v11 = vmul.f32 0.0, %v2103_v54 }
 0x159   :  { %v698_v23 = vadd.f32 %v697_v62, %v374_v0 }
 0x15b   :  { %2104 = vtanh.f32 %v698_v23 }
 0x165   :  { %v2105_v17 = vpop.eup %2104 }
 0x166   :  { %v701_v31 = vmul.f32 %v2105_v17, %v700_v28 }
 0x168   :  { %v2596_v43 = vadd.f32 %v702_v11, %v701_v31 }
 0x16a   :  { %704 = vst [vmem:[%s2913_s7] sm:$0xff] %v2596_v43  ;;  %v712_v63 = vpack.c.bf16 %v2596_v43, %v2596_v43 }
 0x16c   :  { %746 = vmatmul.mubr.bf16.vlgmr.msra.gmra.mrb[20].mxu0 %v712_v63  ;;  %1868 = vmatmul.mubr.bf16.vlgmr.msra.gmra.mrb[12].mxu1 %v712_v63 }
 0x16d   :  { %827 = vmatpush1.bf16.msra.mxu0 %v2400_v26  ;;  %1872 = vmatpush3.bf16.msra.mxu1 %v2430_v37 }
 0x16e   :  { %828 = vmatprep.subr.bf16.mxu0 %v2403_v27  ;;  %1873 = vmatprep.subr.bf16.mxu1 %v2923_v5 }
 0x16f   :  { %858 = vmatprep.mubr.bf16.mxu0 %v2924_v15  ;;  %1887 = vmatprep.mubr.msk.bf16.mxu1 %vm2255_vm0, %v2923_v5 }
 0x171   :  { %829 = vmatpush1.bf16.msra.mxu0 %v2409_v29  ;;  %1874 = vmatpush3.bf16.msra.mxu1 %v2436_v39 }
 0x172   :  { %830 = vmatprep.subr.bf16.mxu0 %v2413_v30  ;;  %1875 = vmatprep.subr.bf16.mxu1 %v2923_v5 }
 0x175   :  { %831 = vmatpush1.bf16.msra.mxu0 %v2419_v32  ;;  %1876 = vmatpush3.bf16.msra.mxu1 %v2448_v42 }
 0x176   :  { %832 = vmatprep.subr.bf16.mxu0 %v2422_v33  ;;  %1877 = vmatprep.subr.bf16.mxu1 %v2923_v5 }
 0x179   :  { %833 = vmatpush1.bf16.msra.mxu0 %v2424_v34  ;;  %1878 = vmatpush3.bf16.msra.mxu1 %v2462_v46 }
 0x17a   :  { %834 = vmatprep.subr.bf16.mxu0 %v2432_v38  ;;  %1879 = vmatprep.subr.bf16.mxu1 %v2923_v5 }
 0x17d   :  { %835 = vmatpush1.bf16.msra.mxu0 %v2442_v40  ;;  %1880 = vmatpush3.bf16.msra.mxu1 %v2474_v49 }
 0x17e   :  { %836 = vmatprep.subr.bf16.mxu0 %v2445_v41  ;;  %1881 = vmatprep.subr.bf16.mxu1 %v2923_v5 }
 0x181   :  { %837 = vmatpush1.bf16.msra.mxu0 %v2455_v44  ;;  %1882 = vmatpush3.bf16.msra.mxu1 %v2483_v51 }
 0x182   :  { %838 = vmatprep.subr.bf16.mxu0 %v2459_v45  ;;  %1883 = vmatprep.subr.bf16.mxu1 %v2923_v5 }
 0x185   :  { %839 = vmatpush1.bf16.msra.mxu0 %v2468_v47  ;;  %1884 = vmatpush3.bf16.msra.mxu1 %v2489_v52 }
 0x186   :  { %840 = vmatprep.subr.bf16.mxu0 %v2471_v48  ;;  %1885 = vmatprep.subr.bf16.mxu1 %v2923_v5 }
 0x189   :  { %841 = vmatpush1.bf16.msra.mxu0 %v2478_v50  ;;  %1886 = vmatpush3.bf16.msra.mxu1 %v2497_v53 }
 0x18a   :  { %939 = vmatprep.subr.bf16.mxu0 %v2395_v24  ;;  %1891 = vmatprep.subr.bf16.mxu1 %v2923_v5 }
 0x23f   :  { %v747_v55 = vpop.f32.mrb[20].mxu0  ;;  %v788_v58 = vpop.f32.mrb[12].mxu1 }
 0x240   :  { %v794_v2 = vadd.f32 %v747_v55, %v2538_v1  ;;  %v749_v6 = vpop.f32.mrb[21].mxu0  ;;  %v1869_v10 = vpop.f32.mrb[13].mxu1  ;;  %v808_v11 = vadd.f32 %v2592_v59, %v788_v58 }
 0x241   :  { %v801_v13 = vadd.f32 %v749_v6, %v2540_v4  ;;  %v751_v19 = vpop.f32.mrb[22].mxu0  ;;  %v791_v60 = vpop.f32.mrb[14].mxu1 }
 0x242   :  { %v1684_v61 = vmul.f32 -1.442695, %v794_v2  ;;  %v752_v36 = vpop.f32.mrb[23].mxu0  ;;  %v1870_v0 = vpop.f32.mrb[15].mxu1 }
 0x243   :  { %v1685_v62 = vmul.f32 -1.442695, %v801_v13 }
 0x244   :  { %2106 = vpow2.f32 %v1684_v61 }
 0x245   :  { %2108 = vpow2.f32 %v1685_v62 }
 0x24e   :  { %v2107_v23 = vpop.eup %2106 }
 0x24f   :  { %v798_v54 = vadd.f32 1.0, %v2107_v23  ;;  %v2109_v28 = vpop.eup %2108 }
 0x250   :  { %v805_v17 = vadd.f32 1.0, %v2109_v28 }
 0x251   :  { %2110 = vrcp.f32 %v798_v54 }
 0x252   :  { %2112 = vrcp.f32 %v805_v17 }
 0x25b   :  { %v2111_v1 = vpop.eup %2110 }
 0x25c   :  { %v809_v31 = vmul.f32 %v2111_v1, %v808_v11  ;;  %v2113_v63 = vpop.eup %2112 }
 0x25d   :  { %v812_v55 = vsub.f32 1.0, %v2113_v63  ;;  %v814_v6 = vmul.f32 %v2113_v63, %v2596_v43 }
 0x25e   :  { %v810_v4 = vadd.f32 %v809_v31, %v2559_v20 }
 0x260   :  { %2114 = vtanh.f32 %v810_v4 }
 0x26a   :  { %v2115_v2 = vpop.eup %2114 }
 0x26b   :  { %v813_v10 = vmul.f32 %v2115_v2, %v812_v55 }
 0x26d   :  { %v2644_v13 = vadd.f32 %v814_v6, %v813_v10 }
 0x26f   :  { %1686 = vst [vmem:[%s2913_s7 + $0x8] sm:$0xff] %v2644_v13  ;;  %v825_v58 = vpack.c.bf16 %v2644_v13, %v2644_v13 }
 0x271   :  { %859 = vmatmul.mubr.bf16.vlgmr.msra.gmra.mrb[24].mxu0 %v825_v58  ;;  %1888 = vmatmul.mubr.bf16.vlgmr.msra.gmra.mrb[16].mxu1 %v825_v58 }
 0x272   :  { %940 = vmatpush1.bf16.msra.mxu0 %v2400_v26  ;;  %1892 = vmatpush3.bf16.msra.mxu1 %v2430_v37 }
 0x273   :  { %941 = vmatprep.subr.bf16.mxu0 %v2403_v27  ;;  %1893 = vmatprep.subr.bf16.mxu1 %v2923_v5 }
 0x274   :  { %971 = vmatprep.mubr.bf16.mxu0 %v2924_v15  ;;  %1907 = vmatprep.mubr.msk.bf16.mxu1 %vm2255_vm0, %v2923_v5 }
 0x276   :  { %942 = vmatpush1.bf16.msra.mxu0 %v2409_v29  ;;  %1894 = vmatpush3.bf16.msra.mxu1 %v2436_v39 }
 0x277   :  { %943 = vmatprep.subr.bf16.mxu0 %v2413_v30  ;;  %1895 = vmatprep.subr.bf16.mxu1 %v2923_v5 }
 0x27a   :  { %944 = vmatpush1.bf16.msra.mxu0 %v2419_v32  ;;  %1896 = vmatpush3.bf16.msra.mxu1 %v2448_v42 }
 0x27b   :  { %945 = vmatprep.subr.bf16.mxu0 %v2422_v33  ;;  %1897 = vmatprep.subr.bf16.mxu1 %v2923_v5 }
 0x27e   :  { %946 = vmatpush1.bf16.msra.mxu0 %v2424_v34  ;;  %1898 = vmatpush3.bf16.msra.mxu1 %v2462_v46 }
 0x27f   :  { %947 = vmatprep.subr.bf16.mxu0 %v2432_v38  ;;  %1899 = vmatprep.subr.bf16.mxu1 %v2923_v5 }
 0x282   :  { %948 = vmatpush1.bf16.msra.mxu0 %v2442_v40  ;;  %1900 = vmatpush3.bf16.msra.mxu1 %v2474_v49 }
 0x283   :  { %949 = vmatprep.subr.bf16.mxu0 %v2445_v41  ;;  %1901 = vmatprep.subr.bf16.mxu1 %v2923_v5 }
 0x286   :  { %950 = vmatpush1.bf16.msra.mxu0 %v2455_v44  ;;  %1902 = vmatpush3.bf16.msra.mxu1 %v2483_v51 }
 0x287   :  { %951 = vmatprep.subr.bf16.mxu0 %v2459_v45  ;;  %1903 = vmatprep.subr.bf16.mxu1 %v2923_v5 }
 0x28a   :  { %952 = vmatpush1.bf16.msra.mxu0 %v2468_v47  ;;  %1904 = vmatpush3.bf16.msra.mxu1 %v2489_v52 }
 0x28b   :  { %953 = vmatprep.subr.bf16.mxu0 %v2471_v48  ;;  %1905 = vmatprep.subr.bf16.mxu1 %v2923_v5 }
 0x28e   :  { %954 = vmatpush1.bf16.msra.mxu0 %v2478_v50  ;;  %1906 = vmatpush3.bf16.msra.mxu1 %v2497_v53 }
 0x28f   :  { %1052 = vmatprep.subr.bf16.mxu0 %v2395_v24  ;;  %1911 = vmatprep.subr.bf16.mxu1 %v2923_v5 }
 0x344   :  { %v860_v20 = vpop.f32.mrb[24].mxu0  ;;  %v901_v19 = vpop.f32.mrb[16].mxu1 }
 0x345   :  { %v907_v60 = vadd.f32 %v860_v20, %v2544_v7  ;;  %v862_v61 = vpop.f32.mrb[25].mxu0  ;;  %v1889_v36 = vpop.f32.mrb[17].mxu1  ;;  %v921_v55 = vadd.f32 %v2592_v59, %v901_v19 }
 0x346   :  { %v914_v0 = vadd.f32 %v862_v61, %v2546_v9  ;;  %v864_v62 = vpop.f32.mrb[26].mxu0  ;;  %v904_v23 = vpop.f32.mrb[18].mxu1 }
 0x347   :  { %v1687_v54 = vmul.f32 -1.442695, %v907_v60  ;;  %v865_v28 = vpop.f32.mrb[27].mxu0  ;;  %v1890_v17 = vpop.f32.mrb[19].mxu1 }
 0x348   :  { %v1688_v11 = vmul.f32 -1.442695, %v914_v0 }
 0x349   :  { %2116 = vpow2.f32 %v1687_v54 }
 0x34a   :  { %2118 = vpow2.f32 %v1688_v11 }
 0x353   :  { %v2117_v1 = vpop.eup %2116 }
 0x354   :  { %v911_v31 = vadd.f32 1.0, %v2117_v1  ;;  %v2119_v4 = vpop.eup %2118 }
 0x355   :  { %v918_v63 = vadd.f32 1.0, %v2119_v4 }
 0x356   :  { %2120 = vrcp.f32 %v911_v31 }
 0x357   :  { %2122 = vrcp.f32 %v918_v63 }
 0x360   :  { %v2121_v7 = vpop.eup %2120 }
 0x361   :  { %v922_v2 = vmul.f32 %v2121_v7, %v921_v55  ;;  %v2123_v6 = vpop.eup %2122 }
 0x362   :  { %v925_v10 = vsub.f32 1.0, %v2123_v6  ;;  %v927_v20 = vmul.f32 %v2123_v6, %v2644_v13 }
 0x363   :  { %v923_v9 = vadd.f32 %v922_v2, %v2551_v14 }
 0x365   :  { %2124 = vtanh.f32 %v923_v9 }
 0x36f   :  { %v2125_v58 = vpop.eup %2124 }
 0x370   :  { %v926_v60 = vmul.f32 %v2125_v58, %v925_v10 }
 0x372   :  { %v2692_v61 = vadd.f32 %v927_v20, %v926_v60 }
 0x374   :  { %1689 = vst [vmem:[%s2913_s7 + $0x10] sm:$0xff] %v2692_v61  ;;  %v938_v19 = vpack.c.bf16 %v2692_v61, %v2692_v61 }
 0x376   :  { %972 = vmatmul.mubr.bf16.vlgmr.msra.gmra.mrb[28].mxu0 %v938_v19  ;;  %1908 = vmatmul.mubr.bf16.vlgmr.msra.gmra.mrb[20].mxu1 %v938_v19 }
 0x377   :  { %1053 = vmatpush1.bf16.msra.mxu0 %v2400_v26  ;;  %1912 = vmatpush3.bf16.msra.mxu1 %v2430_v37 }
 0x378   :  { %1054 = vmatprep.subr.bf16.mxu0 %v2403_v27  ;;  %1913 = vmatprep.subr.bf16.mxu1 %v2923_v5 }
 0x379   :  { %1084 = vmatprep.mubr.bf16.mxu0 %v2924_v15  ;;  %1927 = vmatprep.mubr.msk.bf16.mxu1 %vm2255_vm0, %v2923_v5 }
 0x37b   :  { %1055 = vmatpush1.bf16.msra.mxu0 %v2409_v29  ;;  %1914 = vmatpush3.bf16.msra.mxu1 %v2436_v39 }
 0x37c   :  { %1056 = vmatprep.subr.bf16.mxu0 %v2413_v30  ;;  %1915 = vmatprep.subr.bf16.mxu1 %v2923_v5 }
 0x37f   :  { %1057 = vmatpush1.bf16.msra.mxu0 %v2419_v32  ;;  %1916 = vmatpush3.bf16.msra.mxu1 %v2448_v42 }
 0x380   :  { %1058 = vmatprep.subr.bf16.mxu0 %v2422_v33  ;;  %1917 = vmatprep.subr.bf16.mxu1 %v2923_v5 }
 0x383   :  { %1059 = vmatpush1.bf16.msra.mxu0 %v2424_v34  ;;  %1918 = vmatpush3.bf16.msra.mxu1 %v2462_v46 }
 0x384   :  { %1060 = vmatprep.subr.bf16.mxu0 %v2432_v38  ;;  %1919 = vmatprep.subr.bf16.mxu1 %v2923_v5 }
 0x387   :  { %1061 = vmatpush1.bf16.msra.mxu0 %v2442_v40  ;;  %1920 = vmatpush3.bf16.msra.mxu1 %v2474_v49 }
 0x388   :  { %1062 = vmatprep.subr.bf16.mxu0 %v2445_v41  ;;  %1921 = vmatprep.subr.bf16.mxu1 %v2923_v5 }
 0x38b   :  { %1063 = vmatpush1.bf16.msra.mxu0 %v2455_v44  ;;  %1922 = vmatpush3.bf16.msra.mxu1 %v2483_v51 }
 0x38c   :  { %1064 = vmatprep.subr.bf16.mxu0 %v2459_v45  ;;  %1923 = vmatprep.subr.bf16.mxu1 %v2923_v5 }
 0x38f   :  { %1065 = vmatpush1.bf16.msra.mxu0 %v2468_v47  ;;  %1924 = vmatpush3.bf16.msra.mxu1 %v2489_v52 }
 0x390   :  { %1066 = vmatprep.subr.bf16.mxu0 %v2471_v48  ;;  %1925 = vmatprep.subr.bf16.mxu1 %v2923_v5 }
 0x393   :  { %1067 = vmatpush1.bf16.msra.mxu0 %v2478_v50  ;;  %1926 = vmatpush3.bf16.msra.mxu1 %v2497_v53 }
 0x394   :  { %1165 = vmatprep.subr.bf16.mxu0 %v2395_v24  ;;  %1931 = vmatprep.subr.bf16.mxu1 %v2923_v5 }
 0x449   :  { %v973_v14 = vpop.f32.mrb[28].mxu0  ;;  %v1014_v36 = vpop.f32.mrb[20].mxu1 }
 0x44a   :  { %v1020_v0 = vadd.f32 %v973_v14, %v2548_v12  ;;  %v975_v62 = vpop.f32.mrb[29].mxu0  ;;  %v1909_v23 = vpop.f32.mrb[21].mxu1  ;;  %v1034_v9 = vadd.f32 %v2592_v59, %v1014_v36 }
 0x44b   :  { %v1027_v54 = vadd.f32 %v975_v62, %v2553_v16  ;;  %v977_v28 = vpop.f32.mrb[30].mxu0  ;;  %v1017_v17 = vpop.f32.mrb[22].mxu1 }
 0x44c   :  { %v1690_v11 = vmul.f32 -1.442695, %v1020_v0  ;;  %v978_v1 = vpop.f32.mrb[31].mxu0  ;;  %v1910_v31 = vpop.f32.mrb[23].mxu1 }
 0x44d   :  { %v1691_v4 = vmul.f32 -1.442695, %v1027_v54 }
 0x44e   :  { %2126 = vpow2.f32 %v1690_v11 }
 0x44f   :  { %2128 = vpow2.f32 %v1691_v4 }
 0x458   :  { %v2127_v63 = vpop.eup %2126 }
 0x459   :  { %v1024_v55 = vadd.f32 1.0, %v2127_v63  ;;  %v2129_v7 = vpop.eup %2128 }
 0x45a   :  { %v1031_v2 = vadd.f32 1.0, %v2129_v7 }
 0x45b   :  { %2130 = vrcp.f32 %v1024_v55 }
 0x45c   :  { %2132 = vrcp.f32 %v1031_v2 }
 0x465   :  { %v2131_v12 = vpop.eup %2130 }
 0x466   :  { %v1035_v6 = vmul.f32 %v2131_v12, %v1034_v9  ;;  %v2133_v10 = vpop.eup %2132 }
 0x467   :  { %v1038_v58 = vsub.f32 1.0, %v2133_v10  ;;  %v1040_v60 = vmul.f32 %v2133_v10, %v2692_v61 }
 0x468   :  { %v1036_v16 = vadd.f32 %v1035_v6, %v2556_v18 }
 0x46a   :  { %2134 = vtanh.f32 %v1036_v16 }
 0x474   :  { %v2135_v20 = vpop.eup %2134 }
 0x475   :  { %v1039_v19 = vmul.f32 %v2135_v20, %v1038_v58 }
 0x477   :  { %v2740_v14 = vadd.f32 %v1040_v60, %v1039_v19  ;;  %v2800_v60 = vld [vmem:[#allocation3 + $0x1c] ss:$12 sps:$4 sm:$0xff]  }
 0x479   :  { %1692 = vst [vmem:[%s2913_s7 + $0x18] sm:$0xff] %v2740_v14  ;;  %v1051_v36 = vpack.c.bf16 %v2740_v14, %v2740_v14 }
 0x47b   :  { %1085 = vmatmul.mubr.bf16.vlgmr.msra.gmra.mrb[32].mxu0 %v1051_v36  ;;  %1928 = vmatmul.mubr.bf16.vlgmr.msra.gmra.mrb[24].mxu1 %v1051_v36 }
 0x47c   :  { %1166 = vmatpush1.bf16.msra.mxu0 %v2400_v26  ;;  %1932 = vmatpush3.bf16.msra.mxu1 %v2430_v37 }
 0x47d   :  { %1167 = vmatprep.subr.bf16.mxu0 %v2403_v27  ;;  %1933 = vmatprep.subr.bf16.mxu1 %v2923_v5 }
 0x47e   :  { %1197 = vmatprep.mubr.bf16.mxu0 %v2924_v15  ;;  %1947 = vmatprep.mubr.msk.bf16.mxu1 %vm2255_vm0, %v2923_v5 }
 0x480   :  { %1168 = vmatpush1.bf16.msra.mxu0 %v2409_v29  ;;  %1934 = vmatpush3.bf16.msra.mxu1 %v2436_v39 }
 0x481   :  { %1169 = vmatprep.subr.bf16.mxu0 %v2413_v30  ;;  %1935 = vmatprep.subr.bf16.mxu1 %v2923_v5 }
 0x484   :  { %1170 = vmatpush1.bf16.msra.mxu0 %v2419_v32  ;;  %1936 = vmatpush3.bf16.msra.mxu1 %v2448_v42 }
 0x485   :  { %1171 = vmatprep.subr.bf16.mxu0 %v2422_v33  ;;  %1937 = vmatprep.subr.bf16.mxu1 %v2923_v5 }
 0x488   :  { %1172 = vmatpush1.bf16.msra.mxu0 %v2424_v34  ;;  %1938 = vmatpush3.bf16.msra.mxu1 %v2462_v46 }
 0x489   :  { %1173 = vmatprep.subr.bf16.mxu0 %v2432_v38  ;;  %1939 = vmatprep.subr.bf16.mxu1 %v2923_v5 }
 0x48c   :  { %1174 = vmatpush1.bf16.msra.mxu0 %v2442_v40  ;;  %1940 = vmatpush3.bf16.msra.mxu1 %v2474_v49 }
 0x48d   :  { %1175 = vmatprep.subr.bf16.mxu0 %v2445_v41  ;;  %1941 = vmatprep.subr.bf16.mxu1 %v2923_v5 }
 0x490   :  { %1176 = vmatpush1.bf16.msra.mxu0 %v2455_v44  ;;  %1942 = vmatpush3.bf16.msra.mxu1 %v2483_v51 }
 0x491   :  { %1177 = vmatprep.subr.bf16.mxu0 %v2459_v45  ;;  %1943 = vmatprep.subr.bf16.mxu1 %v2923_v5 }
 0x494   :  { %1178 = vmatpush1.bf16.msra.mxu0 %v2468_v47  ;;  %1944 = vmatpush3.bf16.msra.mxu1 %v2489_v52 }
 0x495   :  { %1179 = vmatprep.subr.bf16.mxu0 %v2471_v48  ;;  %1945 = vmatprep.subr.bf16.mxu1 %v2923_v5 }
 0x498   :  { %1180 = vmatpush1.bf16.msra.mxu0 %v2478_v50  ;;  %1946 = vmatpush3.bf16.msra.mxu1 %v2497_v53 }
 0x499   :  { %1278 = vmatprep.subr.bf16.mxu0 %v2395_v24  ;;  %1951 = vmatprep.subr.bf16.mxu1 %v2923_v5 }
 0x54e   :  { %v1086_v26 = vpop.f32.mrb[32].mxu0  ;;  %v1127_v27 = vpop.f32.mrb[24].mxu1 }
 0x54f   :  { %v1133_v18 = vadd.f32 %v1086_v26, %v2561_v22  ;;  %v1088_v0 = vpop.f32.mrb[33].mxu0  ;;  %v1929_v62 = vpop.f32.mrb[25].mxu1  ;;  %v1147_v7 = vadd.f32 %v2592_v59, %v1127_v27 }
 0x550   :  { %v1140_v23 = vadd.f32 %v1088_v0, %v2563_v25  ;;  %v1090_v54 = vpop.f32.mrb[34].mxu0  ;;  %v1130_v28 = vpop.f32.mrb[26].mxu1 }
 0x551   :  { %v1693_v17 = vmul.f32 -1.442695, %v1133_v18  ;;  %v1091_v11 = vpop.f32.mrb[35].mxu0  ;;  %v1930_v1 = vpop.f32.mrb[27].mxu1  ;;  %v2182_v54 = vld [vmem:[#allocation3 + $0x18] ss:$12 sps:$4 sm:$0xff]  }
 0x552   :  { %v1694_v31 = vmul.f32 -1.442695, %v1140_v23  ;;  %v2183_v28 = vld [vmem:[#allocation3 + $0x20] ss:$12 sps:$4 sm:$0xff]   ;;  %v2185_v11 = vld [vmem:[#allocation3 + $0x30] ss:$12 sps:$4 sm:$0xff]  }
 0x553   :  { %2136 = vpow2.f32 %v1693_v17  ;;  %v2184_v17 = vld [vmem:[#allocation3 + $0x34] ss:$12 sps:$4 sm:$0xff]   ;;  %v2186_v1 = vld [vmem:[#allocation3 + $0x38] ss:$12 sps:$4 sm:$0xff]  }
 0x554   :  { %2138 = vpow2.f32 %v1694_v31  ;;  %v2187_v31 = vld [vmem:[#allocation3 + $0x4c] ss:$12 sps:$4 sm:$0xff]  }
 0x55d   :  { %v2137_v4 = vpop.eup %2136 }
 0x55e   :  { %v1137_v24 = vadd.f32 1.0, %v2137_v4  ;;  %v2139_v63 = vpop.eup %2138  ;;  %v2189_v4 = vld [vmem:[#allocation3 + $0x50] ss:$12 sps:$4 sm:$0xff]  }
 0x55f   :  { %v1144_v55 = vadd.f32 1.0, %v2139_v63  ;;  %v2191_v63 = vld [vmem:[#allocation3 + $0x60] ss:$12 sps:$4 sm:$0xff]  }
 0x560   :  { %2140 = vrcp.f32 %v1137_v24  ;;  %v2190_v24 = vld [vmem:[#allocation3 + $0x64] ss:$12 sps:$4 sm:$0xff]  }
 0x561   :  { %2142 = vrcp.f32 %v1144_v55  ;;  %v2192_v55 = vld [vmem:[#allocation3 + $0x68] ss:$12 sps:$4 sm:$0xff]  }
 0x56a   :  { %v2141_v22 = vpop.eup %2140 }
 0x56b   :  { %v1148_v2 = vmul.f32 %v2141_v22, %v1147_v7  ;;  %v2143_v9 = vpop.eup %2142  ;;  %v2193_v7 = vld [vmem:[#allocation3 + $0x7c] ss:$12 sps:$4 sm:$0xff]   ;;  %v2194_v22 = vld [vmem:[#allocation3 + $0x78] ss:$12 sps:$4 sm:$0xff]  }
 0x56c   :  { %v1151_v12 = vsub.f32 1.0, %v2143_v9  ;;  %v1153_v16 = vmul.f32 %v2143_v9, %v2740_v14  ;;  %v2197_v9 = vld [vmem:[#allocation3 + $0xac] ss:$12 sps:$4 sm:$0xff]  }
 0x56d   :  { %v1149_v25 = vadd.f32 %v1148_v2, %v2573_v57  ;;  %v2796_v57 = vld [vmem:[#allocation3] ss:$12 sps:$4 sm:$0xff]  }
 0x56e   :  { %v2195_v2 = vld [vmem:[#allocation3 + $0x94] ss:$12 sps:$4 sm:$0xff]  }
 0x56f   :  { %2144 = vtanh.f32 %v1149_v25  ;;  %v2196_v25 = vld [vmem:[#allocation3 + $0x90] ss:$12 sps:$4 sm:$0xff]  }
 0x579   :  { %v2145_v6 = vpop.eup %2144 }
 0x57a   :  { %v1152_v10 = vmul.f32 %v2145_v6, %v1151_v12  ;;  %v2198_v12 = vld [vmem:[#allocation3 + $0xa8] ss:$12 sps:$4 sm:$0xff]  }
 0x57c   :  { %v2788_v58 = vadd.f32 %v1153_v16, %v1152_v10 }
 0x57e   :  { %1695 = vst [vmem:[%s2913_s7 + $0x20] sm:$0xff] %v2788_v58  ;;  %v1164_v20 = vpack.c.bf16 %v2788_v58, %v2788_v58 }
 0x580   :  { %1198 = vmatmul.mubr.bf16.vlgmr.msra.gmra.mrb[36].mxu0 %v1164_v20  ;;  %1948 = vmatmul.mubr.bf16.vlgmr.msra.gmra.mrb[28].mxu1 %v1164_v20 }
 0x581   :  { %1279 = vmatpush1.bf16.msra.mxu0 %v2796_v57  ;;  %1952 = vmatpush3.bf16.msra.mxu1 %v2430_v37 }
 0x582   :  { %1280 = vmatprep.subr.bf16.mxu0 %v2800_v60  ;;  %1953 = vmatprep.subr.bf16.mxu1 %v2923_v5 }
 0x583   :  { %1310 = vmatprep.mubr.bf16.mxu0 %v2924_v15  ;;  %1967 = vmatprep.mubr.msk.bf16.mxu1 %vm2255_vm0, %v2923_v5 }
 0x585   :  { %1281 = vmatpush1.bf16.msra.mxu0 %v2409_v29  ;;  %1954 = vmatpush3.bf16.msra.mxu1 %v2436_v39  ;;  %v2180_v29 = vld [vmem:[#allocation3 + $0x4] ss:$12 sps:$4 sm:$0xff]  }
 0x586   :  { %1282 = vmatprep.subr.bf16.mxu0 %v2413_v30  ;;  %1955 = vmatprep.subr.bf16.mxu1 %v2923_v5 }
 0x589   :  { %1283 = vmatpush1.bf16.msra.mxu0 %v2419_v32  ;;  %1956 = vmatpush3.bf16.msra.mxu1 %v2448_v42 }
 0x58a   :  { %1284 = vmatprep.subr.bf16.mxu0 %v2422_v33  ;;  %1957 = vmatprep.subr.bf16.mxu1 %v2923_v5 }
 0x58d   :  { %1285 = vmatpush1.bf16.msra.mxu0 %v2424_v34  ;;  %1958 = vmatpush3.bf16.msra.mxu1 %v2462_v46 }
 0x58e   :  { %1286 = vmatprep.subr.bf16.mxu0 %v2432_v38  ;;  %1959 = vmatprep.subr.bf16.mxu1 %v2923_v5 }
 0x591   :  { %1287 = vmatpush1.bf16.msra.mxu0 %v2442_v40  ;;  %1960 = vmatpush3.bf16.msra.mxu1 %v2474_v49 }
 0x592   :  { %1288 = vmatprep.subr.bf16.mxu0 %v2445_v41  ;;  %1961 = vmatprep.subr.bf16.mxu1 %v2923_v5 }
 0x595   :  { %1289 = vmatpush1.bf16.msra.mxu0 %v2455_v44  ;;  %1962 = vmatpush3.bf16.msra.mxu1 %v2483_v51 }
 0x596   :  { %1290 = vmatprep.subr.bf16.mxu0 %v2459_v45  ;;  %1963 = vmatprep.subr.bf16.mxu1 %v2923_v5 }
 0x599   :  { %1291 = vmatpush1.bf16.msra.mxu0 %v2468_v47  ;;  %1964 = vmatpush3.bf16.msra.mxu1 %v2489_v52 }
 0x59a   :  { %1292 = vmatprep.subr.bf16.mxu0 %v2471_v48  ;;  %1965 = vmatprep.subr.bf16.mxu1 %v2923_v5 }
 0x59d   :  { %1293 = vmatpush1.bf16.msra.mxu0 %v2478_v50  ;;  %1966 = vmatpush3.bf16.msra.mxu1 %v2497_v53 }
 0x59e   :  { %1391 = vmatprep.subr.bf16.mxu0 %v2180_v29  ;;  %1971 = vmatprep.subr.bf16.mxu1 %v2923_v5 }
 0x653   :  { %v1199_v30 = vpop.f32.mrb[36].mxu0  ;;  %v1240_v32 = vpop.f32.mrb[28].mxu1 }
 0x654   :  { %v1246_v33 = vadd.f32 %v1199_v30, %v2565_v35  ;;  %v1201_v34 = vpop.f32.mrb[37].mxu0  ;;  %v1949_v37 = vpop.f32.mrb[29].mxu1  ;;  %v1260_v50 = vadd.f32 %v2592_v59, %v1240_v32 }
 0x655   :  { %v1253_v38 = vadd.f32 %v1201_v34, %v2570_v56  ;;  %v1203_v39 = vpop.f32.mrb[38].mxu0  ;;  %v1243_v40 = vpop.f32.mrb[30].mxu1 }
 0x656   :  { %v1696_v41 = vmul.f32 -1.442695, %v1246_v33  ;;  %v1204_v42 = vpop.f32.mrb[39].mxu0  ;;  %v1950_v44 = vpop.f32.mrb[31].mxu1 }
 0x657   :  { %v1697_v45 = vmul.f32 -1.442695, %v1253_v38  ;;  %v2926_v42 = vld [vmem:[#allocation9_spill] sm:$0xff] }
 0x658   :  { %2146 = vpow2.f32 %v1696_v41 }
 0x659   :  { %2148 = vpow2.f32 %v1697_v45 }
 0x662   :  { %v2147_v46 = vpop.eup %2146 }
 0x663   :  { %v1250_v47 = vadd.f32 1.0, %v2147_v46  ;;  %v2149_v48 = vpop.eup %2148 }
 0x664   :  { %v1257_v49 = vadd.f32 1.0, %v2149_v48 }
 0x665   :  { %2150 = vrcp.f32 %v1250_v47 }
 0x666   :  { %2152 = vrcp.f32 %v1257_v49 }
 0x66f   :  { %v2151_v35 = vpop.eup %2150 }
 0x670   :  { %v1261_v19 = vmul.f32 %v2151_v35, %v1260_v50  ;;  %v2153_v36 = vpop.eup %2152 }
 0x671   :  { %v1264_v26 = vsub.f32 1.0, %v2153_v36  ;;  %v1266_v18 = vmul.f32 %v2153_v36, %v2788_v58  ;;  %v2090_v36 = vld [vmem:[#allocation5 + $0x10] sm:$0xff]  }
 0x672   :  { %v1262_v56 = vadd.f32 %v1261_v19, %v2579_v3  ;;  %v2181_v3 = vld [vmem:[#allocation3 + $0x8] ss:$12 sps:$4 sm:$0xff]   ;;  %v2088_v19 = vld [vmem:[#allocation5] sm:$0xff]  }
 0x674   :  { %2154 = vtanh.f32 %v1262_v56  ;;  %v2089_v56 = vld [vmem:[#allocation5 + $0x8] sm:$0xff]  }
 0x67e   :  { %v2155_v27 = vpop.eup %2154 }
 0x67f   :  { %v1265_v0 = vmul.f32 %v2155_v27, %v1264_v26  ;;  %v2091_v26 = vld [vmem:[#allocation5 + $0x18] sm:$0xff]   ;;  %v2092_v27 = vld [vmem:[#allocation5 + $0x20] sm:$0xff]  }
 0x681   :  { %v2839_v62 = vadd.f32 %v1266_v18, %v1265_v0  ;;  %v2093_v18 = vld [vmem:[#allocation5 + $0x28] sm:$0xff]   ;;  %v2094_v0 = vld [vmem:[#allocation5 + $0x30] sm:$0xff]  }
 0x683   :  { %1698 = vst [vmem:[%s2913_s7 + $0x28] sm:$0xff] %v2839_v62  ;;  %v1277_v23 = vpack.c.bf16 %v2839_v62, %v2839_v62 }
 0x685   :  { %1311 = vmatmul.mubr.bf16.vlgmr.msra.gmra.mrb[40].mxu0 %v1277_v23  ;;  %1968 = vmatmul.mubr.bf16.vlgmr.msra.gmra.mrb[32].mxu1 %v1277_v23  ;;  %v2095_v23 = vld [vmem:[#allocation5 + $0x38] sm:$0xff]  }
 0x686   :  { %1392 = vmatpush1.bf16.msra.mxu0 %v2796_v57  ;;  %1972 = vmatpush3.bf16.msra.mxu1 %v2181_v3  ;;  %v2925_v57 = vld [vmem:[#allocation11_spill] sm:$0xff] }
 0x687   :  { %1393 = vmatprep.subr.bf16.mxu0 %v2800_v60  ;;  %1973 = vmatprep.subr.bf16.mxu1 %v2923_v5 }
 0x688   :  { %1423 = vmatprep.mubr.bf16.mxu0 %v2924_v15  ;;  %1987 = vmatprep.mubr.msk.bf16.mxu1 %vm2255_vm0, %v2923_v5  ;;  %v2188_v15 = vld [vmem:[#allocation3 + $0x48] ss:$12 sps:$4 sm:$0xff]  }
 0x68a   :  { %1394 = vmatpush1.bf16.msra.mxu0 %v2182_v54  ;;  %1974 = vmatpush3.bf16.msra.mxu1 %v2183_v28  ;;  %v2927_v28 = vld [vmem:[#allocation12_spill] sm:$0xff] }
 0x68b   :  { %1395 = vmatprep.subr.bf16.mxu0 %v2184_v17  ;;  %1975 = vmatprep.subr.bf16.mxu1 %v2923_v5 }
 0x68e   :  { %1396 = vmatpush1.bf16.msra.mxu0 %v2185_v11  ;;  %1976 = vmatpush3.bf16.msra.mxu1 %v2186_v1 }
 0x68f   :  { %1397 = vmatprep.subr.bf16.mxu0 %v2187_v31  ;;  %1977 = vmatprep.subr.bf16.mxu1 %v2923_v5 }
 0x692   :  { %1398 = vmatpush1.bf16.msra.mxu0 %v2188_v15  ;;  %1978 = vmatpush3.bf16.msra.mxu1 %v2189_v4 }
 0x693   :  { %1399 = vmatprep.subr.bf16.mxu0 %v2190_v24  ;;  %1979 = vmatprep.subr.bf16.mxu1 %v2923_v5 }
 0x696   :  { %1400 = vmatpush1.bf16.msra.mxu0 %v2191_v63  ;;  %1980 = vmatpush3.bf16.msra.mxu1 %v2192_v55 }
 0x697   :  { %1401 = vmatprep.subr.bf16.mxu0 %v2193_v7  ;;  %1981 = vmatprep.subr.bf16.mxu1 %v2923_v5 }
 0x69a   :  { %1402 = vmatpush1.bf16.msra.mxu0 %v2194_v22  ;;  %1982 = vmatpush3.bf16.msra.mxu1 %v2483_v51 }
 0x69b   :  { %1403 = vmatprep.subr.bf16.mxu0 %v2195_v2  ;;  %1983 = vmatprep.subr.bf16.mxu1 %v2923_v5 }
 0x69e   :  { %1404 = vmatpush1.bf16.msra.mxu0 %v2196_v25  ;;  %1984 = vmatpush3.bf16.msra.mxu1 %v2489_v52 }
 0x69f   :  { %1405 = vmatprep.subr.bf16.mxu0 %v2197_v9  ;;  %1985 = vmatprep.subr.bf16.mxu1 %v2923_v5 }
 0x6a2   :  { %1406 = vmatpush1.bf16.msra.mxu0 %v2198_v12  ;;  %1986 = vmatpush3.bf16.msra.mxu1 %v2497_v53 }
 0x6a3   :  { %1991 = vmatprep.subr.bf16.mxu0 %v2923_v5 }
 0x758   :  { %v1312_v6 = vpop.f32.mrb[40].mxu0  ;;  %v1353_v51 = vpop.f32.mrb[32].mxu1 }
 0x759   :  { %v1359_v16 = vadd.f32 %v1312_v6, %v2581_v8  ;;  %v1314_v10 = vpop.f32.mrb[41].mxu0  ;;  %v1969_v20 = vpop.f32.mrb[33].mxu1  ;;  %v1373_v40 = vadd.f32 %v2592_v59, %v1353_v51  ;;  %v2928_v51 = vld [vmem:[#allocation10_spill] sm:$0xff] }
 0x75a   :  { %v1366_v60 = vadd.f32 %v1314_v10, %v2925_v57  ;;  %v1316_v29 = vpop.f32.mrb[42].mxu0  ;;  %v1356_v52 = vpop.f32.mrb[34].mxu1 }
 0x75b   :  { %v1699_v30 = vmul.f32 -1.442695, %v1359_v16  ;;  %v1317_v32 = vpop.f32.mrb[43].mxu0  ;;  %v1970_v33 = vpop.f32.mrb[35].mxu1  ;;  %v818_v16 = vadd.f32 %v2644_v13, %v2596_v43 }
 0x75c   :  { %v1700_v34 = vmul.f32 -1.442695, %v1366_v60 }
 0x75d   :  { %2156 = vpow2.f32 %v1699_v30  ;;  %v931_v10 = vadd.f32 %v2692_v61, %v818_v16 }
 0x75e   :  { %2158 = vpow2.f32 %v1700_v34 }
 0x75f   :  { %v1044_v57 = vadd.f32 %v2740_v14, %v931_v10  ;;  %v1705_v14 = vld [vmem:[%s2912_s6] ss:$0 sm:$0xff] }
 0x761   :  { %v1157_v60 = vadd.f32 %v2788_v58, %v1044_v57 }
 0x767   :  { %v2157_v37 = vpop.eup %2156 }
 0x768   :  { %v1363_v53 = vadd.f32 1.0, %v2157_v37  ;;  %v2159_v38 = vpop.eup %2158 }
 0x769   :  { %v1370_v39 = vadd.f32 1.0, %v2159_v38 }
 0x76a   :  { %2160 = vrcp.f32 %v1363_v53 }
 0x76b   :  { %2162 = vrcp.f32 %v1370_v39 }
 0x774   :  { %v2161_v8 = vpop.eup %2160 }
 0x775   :  { %v1374_v41 = vmul.f32 %v2161_v8, %v1373_v40  ;;  %v2163_v45 = vpop.eup %2162 }
 0x776   :  { %v1377_v46 = vsub.f32 1.0, %v2163_v45  ;;  %v1379_v48 = vmul.f32 %v2163_v45, %v2839_v62 }
 0x777   :  { %v1375_v44 = vadd.f32 %v1374_v41, %v2926_v42 }
 0x779   :  { %2164 = vtanh.f32 %v1375_v44 }
 0x783   :  { %v2165_v47 = vpop.eup %2164 }
 0x784   :  { %v1378_v49 = vmul.f32 %v2165_v47, %v1377_v46 }
 0x786   :  { %v2868_v50 = vadd.f32 %v1379_v48, %v1378_v49 }
 0x788   :  { %1701 = vst [vmem:[%s2913_s7 + $0x30] sm:$0xff] %v2868_v50  ;;  %v1390_v35 = vpack.c.bf16 %v2868_v50, %v2868_v50 }
 0x78a   :  { %1424 = vmatmul.mubr.bf16.vlgmr.msra.gmra.mrb[44].mxu0 %v1390_v35  ;;  %1988 = vmatmul.mubr.bf16.vlgmr.msra.gmra.mrb[36].mxu1 %v1390_v35 }
 0x78b   :  { %2007 = vmatprep.mubr.msk.bf16.mxu0 %vm2255_vm0, %v2923_v5  ;;  %1992 = vmatpush3.bf16.msra.mxu0 %v2088_v19 }
 0x78c   :  { %1993 = vmatprep.subr.bf16.mxu0 %v2923_v5 }
 0x78f   :  { %1994 = vmatpush3.bf16.msra.mxu0 %v2089_v56 }
 0x790   :  { %1995 = vmatprep.subr.bf16.mxu0 %v2923_v5 }
 0x793   :  { %1996 = vmatpush3.bf16.msra.mxu0 %v2090_v36 }
 0x794   :  { %1997 = vmatprep.subr.bf16.mxu0 %v2923_v5 }
 0x797   :  { %1998 = vmatpush3.bf16.msra.mxu0 %v2091_v26 }
 0x798   :  { %1999 = vmatprep.subr.bf16.mxu0 %v2923_v5 }
 0x79b   :  { %2000 = vmatpush3.bf16.msra.mxu0 %v2092_v27 }
 0x79c   :  { %2001 = vmatprep.subr.bf16.mxu0 %v2923_v5 }
 0x79f   :  { %2002 = vmatpush3.bf16.msra.mxu0 %v2093_v18 }
 0x7a0   :  { %2003 = vmatprep.subr.bf16.mxu0 %v2923_v5 }
 0x7a3   :  { %2004 = vmatpush3.bf16.msra.mxu0 %v2094_v0 }
 0x7a4   :  { %2005 = vmatprep.subr.bf16.mxu0 %v2923_v5 }
 0x7a7   :  { %2006 = vmatpush3.bf16.msra.mxu0 %v2095_v23 }
 0x85d   :  { %v1425_v3 = vpop.f32.mrb[44].mxu0  ;;  %v1466_v54 = vpop.f32.mrb[36].mxu1 }
 0x85e   :  { %v1472_v17 = vadd.f32 %v1425_v3, %v2927_v28  ;;  %v1427_v11 = vpop.f32.mrb[45].mxu0  ;;  %v1989_v1 = vpop.f32.mrb[37].mxu1  ;;  %v1486_v9 = vadd.f32 %v2592_v59, %v1466_v54  ;;  %v1270_v59 = vadd.f32 %v2839_v62, %v1157_v60 }
 0x85f   :  { %v1479_v31 = vadd.f32 %v1427_v11, %v2587_v21  ;;  %v1429_v15 = vpop.f32.mrb[46].mxu0  ;;  %v1469_v4 = vpop.f32.mrb[38].mxu1 }
 0x860   :  { %v1702_v24 = vmul.f32 -1.442695, %v1472_v17  ;;  %v1430_v63 = vpop.f32.mrb[47].mxu0  ;;  %v1990_v55 = vpop.f32.mrb[39].mxu1  ;;  %v1383_v33 = vadd.f32 %v2868_v50, %v1270_v59 }
 0x861   :  { %v1703_v7 = vmul.f32 -1.442695, %v1479_v31 }
 0x862   :  { %2166 = vpow2.f32 %v1702_v24 }
 0x863   :  { %2168 = vpow2.f32 %v1703_v7 }
 0x86c   :  { %v2167_v22 = vpop.eup %2166 }
 0x86d   :  { %v1476_v2 = vadd.f32 1.0, %v2167_v22  ;;  %v2169_v5 = vpop.eup %2168 }
 0x86e   :  { %v1483_v25 = vadd.f32 1.0, %v2169_v5 }
 0x86f   :  { %2170 = vrcp.f32 %v1476_v2 }
 0x870   :  { %2172 = vrcp.f32 %v1483_v25 }
 0x879   :  { %v2171_v12 = vpop.eup %2170 }
 0x87a   :  { %v1487_v6 = vmul.f32 %v2171_v12, %v1486_v9  ;;  %v2173_v20 = vpop.eup %2172 }
 0x87b   :  { %v1490_v29 = vsub.f32 1.0, %v2173_v20  ;;  %v1492_v32 = vmul.f32 %v2173_v20, %v2868_v50 }
 0x87c   :  { %v1488_v21 = vadd.f32 %v1487_v6, %v2928_v51 }
 0x87e   :  { %2174 = vtanh.f32 %v1488_v21 }
 0x888   :  { %v2175_v52 = vpop.eup %2174 }
 0x889   :  { %v1491_v30 = vmul.f32 %v2175_v52, %v1490_v29 }
 0x88b   :  { %v1493_v34 = vadd.f32 %v1492_v32, %v1491_v30 }
 0x88d   :  { %1704 = vst [vmem:[%s2913_s7 + $0x38] sm:$0xff] %v1493_v34  ;;  %v1496_v43 = vadd.f32 %v1493_v34, %v1383_v33 }
 0x88f   :  { %v1497_v13 = vmul.f32 0.125, %v1496_v43 }
 0x891   :  { %v1498_v61 = vpack.c.bf16 %v1497_v13, %v1497_v13 }
 0x893   :  { %2008 = vmatmul.mubr.bf16.vlgmr.msra.gmra.mrb[48].mxu0 %v1498_v61 }
 0x966   :  { %v1604_v58 = vpop.f32.mrb[48].mxu0 }
 0x967   :  { %v1605_v62 = vadd.f32 %v1705_v14, %v1604_v58  ;;  %v2009_v37 = vpop.f32.mrb[49].mxu0 }
 0x968   :  { %v1607_v53 = vpop.f32.mrb[50].mxu0 }
 0x969   :  { %2176 = vtanh.f32 %v1605_v62  ;;  %v2010_v38 = vpop.f32.mrb[51].mxu0 }
 0x973   :  { %v2177_v39 = vpop.eup %2176 }
 0x974   :  { %1611 = vst [vmem:[%s2914_s8] sm:$0xff] %v2177_v39 }
 0x975   :  { %1620 = vsyncpa [#allocation4], 1 }
 0x976   :  { %1621 = vsyncpa [#allocation6], 1 }

</bundles_post_ra>
